<compile_context>
chip_gen: v5e
topology: v5e:2x2
jax: 0.10.0
libtpu: 0.0.40
codegen_flags: <defaults>
</compile_context>

<pallas_src>
import functools

import jax
import jax.numpy as jnp
from jax.experimental import pallas as pl
from jax.experimental.pallas import tpu as pltpu


# ----------------------------- Pallas kernel ---------------------------------

def _zero_halo(ref, hi, wi):
    """Zero only the 1-pixel border of a (hi+2, wi+2, C) scratch (interior is
    fully overwritten by the caller every grid step)."""
    c = ref.shape[-1]
    zr = jnp.zeros((1, wi + 2, c), ref.dtype)
    ref[0:1, :, :] = zr
    ref[hi + 1:hi + 2, :, :] = zr
    zc = jnp.zeros((hi + 2, 1, c), ref.dtype)
    ref[:, 0:1, :] = zc
    ref[:, wi + 1:wi + 2, :] = zc


def _basic_block_kernel(x_ref, w1_ref, s1_ref, b1_ref, w2_ref, s2_ref, b2_ref,
                        out_ref, *scratch, stride, h, w, ho, wo, c_in, c_out,
                        has_downsample):
    """Fused BasicBlock (one grid step = one batch element).

    x_ref  : stride==1 -> (1, H, W, Cin) bf16 raw activation
             stride>1  -> (1, s*s, Hs, Ws, Cin) bf16 phase-split padded activation
    w1_ref : (9*Cin, Cout) or (9*Cin, 2*Cout) bf16 (downsample 1x1 fused into cols
             [Cout:2Cout], non-zero only in the center-tap rows)
    w2_ref : (9*Cout, Cout) bf16
    s*/b*  : (1, Cout or 2*Cout) f32 folded-BN scale / bias
    out_ref: (1, Ho*Wo, Cout) bf16
    scratch: y1pad (Ho+2, Wo+2, Cout) bf16, p2 (Ho*Wo, 9*Cout) bf16,
             p1 (Ho*Wo, 9*Cin) bf16 [, xpad (H+2, W+2, Cin) bf16 when stride==1]
    """
    if stride == 1:
        y1pad_ref, p2_ref, p1_ref, xpad_ref = scratch
    else:
        y1pad_ref, p2_ref, p1_ref = scratch

    m = ho * wo

    # ---- conv1 patches built in VMEM (in-kernel im2col, stride folded) ----
    if stride == 1:
        _zero_halo(xpad_ref, h, w)
        xpad_ref[1:h + 1, 1:w + 1, :] = x_ref[0]
        for kh in range(3):
            for kw in range(3):
                k = 3 * kh + kw
                tap = xpad_ref[kh:kh + ho, kw:kw + wo, :]
                p1_ref[:, k * c_in:(k + 1) * c_in] = tap.reshape(m, c_in)
    else:
        s = stride
        for kh in range(3):
            for kw in range(3):
                k = 3 * kh + kw
                ph = (kh % s) * s + (kw % s)
                tap = x_ref[0, ph, kh // s:kh // s + ho, kw // s:kw // s + wo, :]
                p1_ref[:, k * c_in:(k + 1) * c_in] = tap.reshape(m, c_in)

    # ---- conv1 (+ fused 1x1 downsample): one K=9*Cin MXU matmul, f32 accumulate ----
    y = jnp.dot(p1_ref[...], w1_ref[...], preferred_element_type=jnp.float32)
    y = y * s1_ref[...] + b1_ref[...]

    if has_downsample:
        y1 = jnp.maximum(y[:, :c_out], 0.0)        # main path: BN + ReLU
        ident = y[:, c_out:]                        # 1x1 downsample + BN (no ReLU)
    else:
        y1 = jnp.maximum(y, 0.0)
        # no downsample => stride==1 and Cin==Cout: identity is the raw input
        ident = x_ref[0].reshape(m, c_out).astype(jnp.float32)

    # ---- conv2: intermediate kept in VMEM as bf16, one K=9*Cout matmul ----
    _zero_halo(y1pad_ref, ho, wo)
    y1pad_ref[1:ho + 1, 1:wo + 1, :] = y1.reshape(ho, wo, c_out).astype(jnp.bfloat16)
    for kh in range(3):
        for kw in range(3):
            k = 3 * kh + kw
            tap = y1pad_ref[kh:kh + ho, kw:kw + wo, :]
            p2_ref[:, k * c_out:(k + 1) * c_out] = tap.reshape(m, c_out)

    y2 = jnp.dot(p2_ref[...], w2_ref[...], preferred_element_type=jnp.float32)
    y2 = y2 * s2_ref[...] + b2_ref[...]

    out = jnp.maximum(y2 + ident, 0.0)              # residual add + ReLU in f32
    out_ref[...] = out.reshape(1, m, c_out).astype(out_ref.dtype)


# ----------------------------- op wrappers -----------------------------------

def _out_dims(H, W, stride):
    # kernel=3, padding=1, dilation=1
    return (H - 1) // stride + 1, (W - 1) // stride + 1


def _phase_split(x, stride, ho, wo):
    """(N,H,W,C) -> (N, s*s, Hs, Ws, C): pad-by-1 then split into s*s phase images so
    every strided 3x3 tap becomes a contiguous static slice inside the kernel."""
    N, H, W, C = x.shape
    s = stride
    hs, ws = ho + 2 // s, wo + 2 // s
    hp, wp = s * hs, s * ws
    xp = jnp.pad(x, ((0, 0), (1, max(hp - H - 1, 0)), (1, max(wp - W - 1, 0)), (0, 0)))
    xp = xp[:, :hp, :wp, :]
    xph = xp.reshape(N, hs, s, ws, s, C).transpose(0, 2, 4, 1, 3, 5)
    return xph.reshape(N, s * s, hs, ws, C)


def _vmem_limit_bytes():
    """Generation-aware scoped-VMEM budget: ~48 MiB on v7x (64 MiB physical),
    ~96 MiB on v5e/v6e (128 MiB physical)."""
    try:
        cap = pltpu.get_tpu_info().vmem_capacity_bytes
    except Exception:
        cap = 64 * 1024 * 1024
    return int(min(max(cap - 16 * 1024 * 1024, 32 * 1024 * 1024), 96 * 1024 * 1024))


def basic_block_forward(x, p):
    """x: (N,H,W,Cin) NHWC bf16. Returns (N,Ho,Wo,Cout) bf16. One pallas_call per block."""
    N, H, W, Cin = x.shape
    stride = p["stride"]
    has_ds = p["has_ds"]
    Cout = p["s2"].shape[-1]
    Ho, Wo = _out_dims(H, W, stride)
    M = Ho * Wo
    if not has_ds:
        assert stride == 1 and Cin == Cout, "identity path requires stride=1, Cin==Cout"
    nc1 = 2 * Cout if has_ds else Cout
    k1 = 9 * Cin

    const2d = lambda n: (0, 0)

    if stride == 1:
        x_in = x
        x_spec = pl.BlockSpec((1, H, W, Cin), lambda n: (n, 0, 0, 0))
    else:
        x_in = _phase_split(x, stride, Ho, Wo)
        _, nph, Hs, Ws, _ = x_in.shape
        x_spec = pl.BlockSpec((1, nph, Hs, Ws, Cin), lambda n: (n, 0, 0, 0, 0))

    in_specs = [
        x_spec,
        pl.BlockSpec((k1, nc1), const2d),          # w1 (+ fused downsample)
        pl.BlockSpec((1, nc1), const2d),           # s1
        pl.BlockSpec((1, nc1), const2d),           # b1
        pl.BlockSpec((9 * Cout, Cout), const2d),   # w2
        pl.BlockSpec((1, Cout), const2d),          # s2
        pl.BlockSpec((1, Cout), const2d),          # b2
    ]
    scratch = [
        pltpu.VMEM((Ho + 2, Wo + 2, Cout), jnp.bfloat16),   # padded intermediate
        pltpu.VMEM((M, 9 * Cout), jnp.bfloat16),            # conv2 patches
        pltpu.VMEM((M, k1), jnp.bfloat16),                  # conv1 patches
    ]
    if stride == 1:
        scratch.append(pltpu.VMEM((H + 2, W + 2, Cin), jnp.bfloat16))  # padded input

    kernel = functools.partial(
        _basic_block_kernel, stride=stride, h=H, w=W, ho=Ho, wo=Wo,
        c_in=Cin, c_out=Cout, has_downsample=has_ds)

    flops = N * (2 * M * k1 * nc1 + 2 * M * (9 * Cout) * Cout)
    bytes_accessed = int(
        x_in.size * 2 + p["w1k"].size * 2 + p["w2k"].size * 2 +
        (p["s1k"].size + p["b1k"].size + p["s2"].size + p["b2"].size) * 4 +
        N * M * Cout * 2)

    y = pl.pallas_call(
        kernel,
        grid=(N,),
        out_shape=jax.ShapeDtypeStruct((N, M, Cout), jnp.bfloat16),
        in_specs=in_specs,
        out_specs=pl.BlockSpec((1, M, Cout), lambda n: (n, 0, 0)),
        scratch_shapes=scratch,
        compiler_params=pltpu.CompilerParams(
            dimension_semantics=("parallel",),
            vmem_limit_bytes=_vmem_limit_bytes()),
        cost_estimate=pl.CostEstimate(flops=flops, transcendentals=0,
                                      bytes_accessed=bytes_accessed),
    )(x_in, p["w1k"], p["s1k"], p["b1k"], p["w2k"], p["s2"], p["b2"])
    return y.reshape(N, Ho, Wo, Cout)


# ---------------------- parameter init & layer assembly ----------------------

_BN_EPS = 1e-5


def _fold_bn(gamma, beta):
    # running_mean = 0, running_var = 1 (fresh BatchNorm2d, eval mode).
    scale = gamma / jnp.sqrt(1.0 + _BN_EPS)
    return scale[None, :], beta[None, :]


def _init_block(key, in_c, out_c, stride, with_downsample):
    ks = jax.random.split(key, 8)
    std1 = (2.0 / (9 * in_c)) ** 0.5
    std2 = (2.0 / (9 * out_c)) ** 0.5
    w1 = (jax.random.normal(ks[0], (3, 3, in_c, out_c)) * std1).astype(jnp.float32)
    w2 = (jax.random.normal(ks[1], (3, 3, out_c, out_c)) * std2).astype(jnp.float32)
    g1 = 1.0 + 0.1 * jax.random.normal(ks[2], (out_c,))
    b1 = 0.1 * jax.random.normal(ks[3], (out_c,))
    g2 = 1.0 + 0.1 * jax.random.normal(ks[4], (out_c,))
    b2 = 0.1 * jax.random.normal(ks[5], (out_c,))
    s1, b1f = _fold_bn(g1.astype(jnp.float32), b1.astype(jnp.float32))
    s2, b2f = _fold_bn(g2.astype(jnp.float32), b2.astype(jnp.float32))

    p = {"stride": stride, "has_ds": with_downsample,
         "w1": w1, "w2": w2, "s1": s1, "b1": b1f, "s2": s2, "b2": b2f}

    w1k = w1.reshape(9 * in_c, out_c)
    s1k, b1k = s1, b1f
    if with_downsample:
        stdd = (1.0 / in_c) ** 0.5
        wd = (jax.random.normal(ks[6], (in_c, out_c)) * stdd).astype(jnp.float32)
        gd = 1.0 + 0.1 * jax.random.normal(ks[7], (out_c,))
        sd, bd = _fold_bn(gd.astype(jnp.float32), jnp.zeros((out_c,), jnp.float32))
        p.update({"wd": wd, "sd": sd, "bd": bd})
        # fuse the 1x1 downsample into the conv1 matmul: wd lives in the center-tap rows
        wdk = jnp.zeros((9 * in_c, out_c), jnp.float32).at[4 * in_c:5 * in_c].set(wd)
        w1k = jnp.concatenate([w1k, wdk], axis=1)
        s1k = jnp.concatenate([s1, sd], axis=1)
        b1k = jnp.concatenate([b1f, bd], axis=1)

    p["w1k"] = w1k.astype(jnp.bfloat16)
    p["s1k"] = s1k
    p["b1k"] = b1k
    p["w2k"] = w2.reshape(9 * out_c, out_c).astype(jnp.bfloat16)
    return p


class ResNetPallas:
    """Mirrors ResNet._make_layer assembly (reverse=False, BasicBlock, expansion=1)."""
    expansion = 1

    def __init__(self, inplanes, key):
        self.inplanes = inplanes
        self._key = key

    def make_layer(self, planes, repetitions, stride=1):
        key, self._key = jax.random.split(self._key)
        keys = jax.random.split(key, repetitions)
        blocks = []
        # trailing blocks: block(planes*expansion, planes), stride 1, no downsample
        for r in range(1, repetitions):
            blocks.append(_init_block(keys[r], planes * self.expansion, planes,
                                      stride=1, with_downsample=False))
        needs_ds = (stride != 1) or (self.inplanes != planes * self.expansion)
        adjustment = _init_block(keys[0], self.inplanes, planes, stride=stride,
                                 with_downsample=needs_ds)
        self.inplanes = planes * self.expansion
        blocks.insert(0, adjustment)  # reverse=False
        return blocks

    @staticmethod
    def layer_forward(x_nchw, blocks):
        # inter-block activations kept in bf16 (HBM traffic halved); math stays f32
        x = jnp.transpose(x_nchw, (0, 2, 3, 1)).astype(jnp.bfloat16)  # NCHW -> NHWC
        for p in blocks:
            x = basic_block_forward(x, p)
        return jnp.transpose(x, (0, 3, 1, 2)).astype(jnp.float32)     # NHWC -> NCHW


# ----------------------------- pure-JAX reference ----------------------------

def _block_ref(x, p):
    """Reference BasicBlock in NHWC, bf16 activations / bf16 matmul operands /
    f32 accumulation — mirroring the kernel chain."""
    stride = p["stride"]
    dn = ("NHWC", "HWIO", "NHWC")

    def conv3x3(inp, wgt, s):
        return jax.lax.conv_general_dilated(
            inp.astype(jnp.bfloat16), wgt.astype(jnp.bfloat16),
            window_strides=(s, s), padding=((1, 1), (1, 1)),
            dimension_numbers=dn, preferred_element_type=jnp.float32)

    y1 = jnp.maximum(conv3x3(x, p["w1"], stride) * p["s1"] + p["b1"], 0.0)
    y2 = conv3x3(y1, p["w2"], 1) * p["s2"] + p["b2"]
    if p["has_ds"]:
        xs = x[:, ::stride, ::stride, :].astype(jnp.bfloat16)
        ident = jnp.einsum("nhwc,cd->nhwd", xs, p["wd"].astype(jnp.bfloat16),
                           preferred_element_type=jnp.float32)
        ident = ident * p["sd"] + p["bd"]
    else:
        ident = x.astype(jnp.float32)
    return jnp.maximum(y2 + ident, 0.0).astype(jnp.bfloat16)


# ----------------------------------- main ------------------------------------

if __name__ == "__main__":
    key = jax.random.PRNGKey(0)
    k_x, k_p = jax.random.split(key)

    # small shapes: batch=2, inplanes=16, spatial=8x8 (NCHW, like PyTorch)
    N, C_IN, H, W = 2, 16, 8, 8
    x = jax.random.normal(k_x, (N, C_IN, H, W), dtype=jnp.float32)

    model = ResNetPallas(inplanes=C_IN, key=k_p)
    # _make_layer(BasicBlock, planes=32, repetitions=2, stride=2)
    # -> adjustment block with conv1x1+Norm downsample, then one stride-1 block
    layer = model.make_layer(planes=32, repetitions=2, stride=2)

    y = ResNetPallas.layer_forward(x, layer)
    y = jax.block_until_ready(y)

    assert y.shape == (N, 32, H // 2, W // 2), y.shape
    assert bool(jnp.all(jnp.isfinite(y)))

    # correctness check against pure-JAX reference (same bf16 operand rounding)
    ref = jnp.transpose(x, (0, 2, 3, 1)).astype(jnp.bfloat16)
    for p in layer:
        ref = _block_ref(ref, p)
    ref = jnp.transpose(ref.astype(jnp.float32), (0, 3, 1, 2))
    scaled_err = float(jnp.max(jnp.abs(y - ref) / (1.0 + jnp.abs(ref))))
    assert scaled_err < 2e-2, f"max scaled err {scaled_err}"

    print("KERNEL_OK")
</pallas_src>

<mosaic_0001>
module attributes {stable_mosaic.version = 11 : i64} {
  func.func @_basic_block_kernel(%arg0: i32, %arg1: memref<1x4x5x5x16xbf16, #tpu.memory_space<vmem>>, %arg2: memref<144x64xbf16, #tpu.memory_space<vmem>>, %arg3: memref<1x64xf32, #tpu.memory_space<vmem>>, %arg4: memref<1x64xf32, #tpu.memory_space<vmem>>, %arg5: memref<288x32xbf16, #tpu.memory_space<vmem>>, %arg6: memref<1x32xf32, #tpu.memory_space<vmem>>, %arg7: memref<1x32xf32, #tpu.memory_space<vmem>>, %arg8: memref<1x16x32xbf16, #tpu.memory_space<vmem>>, %arg9: memref<6x6x32xbf16, #tpu.memory_space<vmem>>, %arg10: memref<16x288xbf16, #tpu.memory_space<vmem>>, %arg11: memref<16x144xbf16, #tpu.memory_space<vmem>>) attributes {dimension_semantics = [#tpu.dimension_semantics<parallel>], iteration_bounds = array<i64: 2>, scalar_prefetch = 0 : i64, scratch_operands = 3 : i64, tpu.core_type = #tpu.core_type<tc>, window_params = [{transform_indices = @transform_0, window_bounds = array<i64: 1, 4, 5, 5, 16>}, {pipeline_mode = #tpu.pipeline_mode<synchronous>, transform_indices = @transform_1, window_bounds = array<i64: 144, 64>}, {pipeline_mode = #tpu.pipeline_mode<synchronous>, transform_indices = @transform_2, window_bounds = array<i64: 1, 64>}, {pipeline_mode = #tpu.pipeline_mode<synchronous>, transform_indices = @transform_3, window_bounds = array<i64: 1, 64>}, {pipeline_mode = #tpu.pipeline_mode<synchronous>, transform_indices = @transform_4, window_bounds = array<i64: 288, 32>}, {pipeline_mode = #tpu.pipeline_mode<synchronous>, transform_indices = @transform_5, window_bounds = array<i64: 1, 32>}, {pipeline_mode = #tpu.pipeline_mode<synchronous>, transform_indices = @transform_6, window_bounds = array<i64: 1, 32>}, {transform_indices = @transform_7, window_bounds = array<i64: 1, 16, 32>}]} {
    %c0 = arith.constant 0 : index
    %c0_0 = arith.constant 0 : index
    %c0_1 = arith.constant 0 : index
    %c0_2 = arith.constant 0 : index
    %c0_3 = arith.constant 0 : index
    %0 = vector.load %arg1[%c0, %c0_0, %c0_1, %c0_2, %c0_3] : memref<1x4x5x5x16xbf16, #tpu.memory_space<vmem>>, vector<1x1x4x4x16xbf16>
    %1 = vector.shape_cast %0 : vector<1x1x4x4x16xbf16> to vector<4x4x16xbf16>
    %2 = vector.shape_cast %1 : vector<4x4x16xbf16> to vector<16x16xbf16>
    %c0_4 = arith.constant 0 : index
    %c0_5 = arith.constant 0 : index
    %3 = vector.load %arg11[%c0_4, %c0_5] : memref<16x144xbf16, #tpu.memory_space<vmem>>, vector<16x16xbf16>
    tpu.vector_store %arg11[%c0_4, %c0_5], %2 {strides = array<i32>} : memref<16x144xbf16, #tpu.memory_space<vmem>>, vector<16x16xbf16>,
    %c0_6 = arith.constant 0 : index
    %c1 = arith.constant 1 : index
    %c0_7 = arith.constant 0 : index
    %c0_8 = arith.constant 0 : index
    %c0_9 = arith.constant 0 : index
    %4 = vector.load %arg1[%c0_6, %c1, %c0_7, %c0_8, %c0_9] : memref<1x4x5x5x16xbf16, #tpu.memory_space<vmem>>, vector<1x1x4x4x16xbf16>
    %5 = vector.shape_cast %4 : vector<1x1x4x4x16xbf16> to vector<4x4x16xbf16>
    %6 = vector.shape_cast %5 : vector<4x4x16xbf16> to vector<16x16xbf16>
    %c0_10 = arith.constant 0 : index
    %c16 = arith.constant 16 : index
    %7 = vector.load %arg11[%c0_10, %c16] : memref<16x144xbf16, #tpu.memory_space<vmem>>, vector<16x16xbf16>
    tpu.vector_store %arg11[%c0_10, %c16], %6 {strides = array<i32>} : memref<16x144xbf16, #tpu.memory_space<vmem>>, vector<16x16xbf16>,
    %c0_11 = arith.constant 0 : index
    %c0_12 = arith.constant 0 : index
    %c0_13 = arith.constant 0 : index
    %c1_14 = arith.constant 1 : index
    %c0_15 = arith.constant 0 : index
    %8 = vector.load %arg1[%c0_11, %c0_12, %c0_13, %c1_14, %c0_15] : memref<1x4x5x5x16xbf16, #tpu.memory_space<vmem>>, vector<1x1x4x4x16xbf16>
    %9 = vector.shape_cast %8 : vector<1x1x4x4x16xbf16> to vector<4x4x16xbf16>
    %10 = vector.shape_cast %9 : vector<4x4x16xbf16> to vector<16x16xbf16>
    %c0_16 = arith.constant 0 : index
    %c32 = arith.constant 32 : index
    %11 = vector.load %arg11[%c0_16, %c32] : memref<16x144xbf16, #tpu.memory_space<vmem>>, vector<16x16xbf16>
    tpu.vector_store %arg11[%c0_16, %c32], %10 {strides = array<i32>} : memref<16x144xbf16, #tpu.memory_space<vmem>>, vector<16x16xbf16>,
    %c0_17 = arith.constant 0 : index
    %c2 = arith.constant 2 : index
    %c0_18 = arith.constant 0 : index
    %c0_19 = arith.constant 0 : index
    %c0_20 = arith.constant 0 : index
    %12 = vector.load %arg1[%c0_17, %c2, %c0_18, %c0_19, %c0_20] : memref<1x4x5x5x16xbf16, #tpu.memory_space<vmem>>, vector<1x1x4x4x16xbf16>
    %13 = vector.shape_cast %12 : vector<1x1x4x4x16xbf16> to vector<4x4x16xbf16>
    %14 = vector.shape_cast %13 : vector<4x4x16xbf16> to vector<16x16xbf16>
    %c0_21 = arith.constant 0 : index
    %c48 = arith.constant 48 : index
    %15 = vector.load %arg11[%c0_21, %c48] : memref<16x144xbf16, #tpu.memory_space<vmem>>, vector<16x16xbf16>
    tpu.vector_store %arg11[%c0_21, %c48], %14 {strides = array<i32>} : memref<16x144xbf16, #tpu.memory_space<vmem>>, vector<16x16xbf16>,
    %c0_22 = arith.constant 0 : index
    %c3 = arith.constant 3 : index
    %c0_23 = arith.constant 0 : index
    %c0_24 = arith.constant 0 : index
    %c0_25 = arith.constant 0 : index
    %16 = vector.load %arg1[%c0_22, %c3, %c0_23, %c0_24, %c0_25] : memref<1x4x5x5x16xbf16, #tpu.memory_space<vmem>>, vector<1x1x4x4x16xbf16>
    %17 = vector.shape_cast %16 : vector<1x1x4x4x16xbf16> to vector<4x4x16xbf16>
    %18 = vector.shape_cast %17 : vector<4x4x16xbf16> to vector<16x16xbf16>
    %c0_26 = arith.constant 0 : index
    %c64 = arith.constant 64 : index
    %19 = vector.load %arg11[%c0_26, %c64] : memref<16x144xbf16, #tpu.memory_space<vmem>>, vector<16x16xbf16>
    tpu.vector_store %arg11[%c0_26, %c64], %18 {strides = array<i32>} : memref<16x144xbf16, #tpu.memory_space<vmem>>, vector<16x16xbf16>,
    %c0_27 = arith.constant 0 : index
    %c2_28 = arith.constant 2 : index
    %c0_29 = arith.constant 0 : index
    %c1_30 = arith.constant 1 : index
    %c0_31 = arith.constant 0 : index
    %20 = vector.load %arg1[%c0_27, %c2_28, %c0_29, %c1_30, %c0_31] : memref<1x4x5x5x16xbf16, #tpu.memory_space<vmem>>, vector<1x1x4x4x16xbf16>
    %21 = vector.shape_cast %20 : vector<1x1x4x4x16xbf16> to vector<4x4x16xbf16>
    %22 = vector.shape_cast %21 : vector<4x4x16xbf16> to vector<16x16xbf16>
    %c0_32 = arith.constant 0 : index
    %c80 = arith.constant 80 : index
    %23 = vector.load %arg11[%c0_32, %c80] : memref<16x144xbf16, #tpu.memory_space<vmem>>, vector<16x16xbf16>
    tpu.vector_store %arg11[%c0_32, %c80], %22 {strides = array<i32>} : memref<16x144xbf16, #tpu.memory_space<vmem>>, vector<16x16xbf16>,
    %c0_33 = arith.constant 0 : index
    %c0_34 = arith.constant 0 : index
    %c1_35 = arith.constant 1 : index
    %c0_36 = arith.constant 0 : index
    %c0_37 = arith.constant 0 : index
    %24 = vector.load %arg1[%c0_33, %c0_34, %c1_35, %c0_36, %c0_37] : memref<1x4x5x5x16xbf16, #tpu.memory_space<vmem>>, vector<1x1x4x4x16xbf16>
    %25 = vector.shape_cast %24 : vector<1x1x4x4x16xbf16> to vector<4x4x16xbf16>
    %26 = vector.shape_cast %25 : vector<4x4x16xbf16> to vector<16x16xbf16>
    %c0_38 = arith.constant 0 : index
    %c96 = arith.constant 96 : index
    %27 = vector.load %arg11[%c0_38, %c96] : memref<16x144xbf16, #tpu.memory_space<vmem>>, vector<16x16xbf16>
    tpu.vector_store %arg11[%c0_38, %c96], %26 {strides = array<i32>} : memref<16x144xbf16, #tpu.memory_space<vmem>>, vector<16x16xbf16>,
    %c0_39 = arith.constant 0 : index
    %c1_40 = arith.constant 1 : index
    %c1_41 = arith.constant 1 : index
    %c0_42 = arith.constant 0 : index
    %c0_43 = arith.constant 0 : index
    %28 = vector.load %arg1[%c0_39, %c1_40, %c1_41, %c0_42, %c0_43] : memref<1x4x5x5x16xbf16, #tpu.memory_space<vmem>>, vector<1x1x4x4x16xbf16>
    %29 = vector.shape_cast %28 : vector<1x1x4x4x16xbf16> to vector<4x4x16xbf16>
    %30 = vector.shape_cast %29 : vector<4x4x16xbf16> to vector<16x16xbf16>
    %c0_44 = arith.constant 0 : index
    %c112 = arith.constant 112 : index
    %31 = vector.load %arg11[%c0_44, %c112] : memref<16x144xbf16, #tpu.memory_space<vmem>>, vector<16x16xbf16>
    tpu.vector_store %arg11[%c0_44, %c112], %30 {strides = array<i32>} : memref<16x144xbf16, #tpu.memory_space<vmem>>, vector<16x16xbf16>,
    %c0_45 = arith.constant 0 : index
    %c0_46 = arith.constant 0 : index
    %c1_47 = arith.constant 1 : index
    %c1_48 = arith.constant 1 : index
    %c0_49 = arith.constant 0 : index
    %32 = vector.load %arg1[%c0_45, %c0_46, %c1_47, %c1_48, %c0_49] : memref<1x4x5x5x16xbf16, #tpu.memory_space<vmem>>, vector<1x1x4x4x16xbf16>
    %33 = vector.shape_cast %32 : vector<1x1x4x4x16xbf16> to vector<4x4x16xbf16>
    %34 = vector.shape_cast %33 : vector<4x4x16xbf16> to vector<16x16xbf16>
    %c0_50 = arith.constant 0 : index
    %c128 = arith.constant 128 : index
    %35 = vector.load %arg11[%c0_50, %c128] : memref<16x144xbf16, #tpu.memory_space<vmem>>, vector<16x16xbf16>
    tpu.vector_store %arg11[%c0_50, %c128], %34 {strides = array<i32>} : memref<16x144xbf16, #tpu.memory_space<vmem>>, vector<16x16xbf16>,
    %c0_51 = arith.constant 0 : index
    %c0_52 = arith.constant 0 : index
    %36 = vector.load %arg11[%c0_51, %c0_52] : memref<16x144xbf16, #tpu.memory_space<vmem>>, vector<16x144xbf16>
    %c0_53 = arith.constant 0 : index
    %c0_54 = arith.constant 0 : index
    %37 = vector.load %arg2[%c0_53, %c0_54] : memref<144x64xbf16, #tpu.memory_space<vmem>>, vector<144x64xbf16>
    %cst = arith.constant dense<0.000000e+00> : vector<16x64xf32>
    %38 = tpu.matmul %36, %37, %cst {dimension_numbers = #tpu.dot_dimension_numbers<[1], [0], [0], [1], [0, 0, 1, 1], [], []>} : vector<16x144xbf16>, vector<144x64xbf16>, vector<16x64xf32> -> vector<16x64xf32>
    %c0_55 = arith.constant 0 : index
    %c0_56 = arith.constant 0 : index
    %39 = vector.load %arg3[%c0_55, %c0_56] : memref<1x64xf32, #tpu.memory_space<vmem>>, vector<1x64xf32>
    %40 = vector.broadcast %39 : vector<1x64xf32> to vector<16x64xf32>
    %41 = arith.mulf %38, %40 : vector<16x64xf32>
    %c0_57 = arith.constant 0 : index
    %c0_58 = arith.constant 0 : index
    %42 = vector.load %arg4[%c0_57, %c0_58] : memref<1x64xf32, #tpu.memory_space<vmem>>, vector<1x64xf32>
    %43 = vector.broadcast %42 : vector<1x64xf32> to vector<16x64xf32>
    %44 = arith.addf %41, %43 : vector<16x64xf32>
    %45 = vector.extract_strided_slice %44 {offsets = [0, 0], sizes = [16, 32], strides = [1, 1]} : vector<16x64xf32> to vector<16x32xf32>
    %cst_59 = arith.constant 0.000000e+00 : f32
    %46 = vector.broadcast %cst_59 : f32 to vector<16x32xf32>
    %47 = arith.maximumf %45, %46 : vector<16x32xf32>
    %48 = vector.extract_strided_slice %44 {offsets = [0, 32], sizes = [16, 32], strides = [1, 1]} : vector<16x64xf32> to vector<16x32xf32>
    %cst_60 = arith.constant 0.000000e+00 : bf16
    %49 = vector.broadcast %cst_60 : bf16 to vector<1x6x32xbf16>
    %c0_61 = arith.constant 0 : index
    %c0_62 = arith.constant 0 : index
    %c0_63 = arith.constant 0 : index
    %50 = vector.load %arg9[%c0_61, %c0_62, %c0_63] : memref<6x6x32xbf16, #tpu.memory_space<vmem>>, vector<1x6x32xbf16>
    tpu.vector_store %arg9[%c0_61, %c0_62, %c0_63], %49 {strides = array<i32>} : memref<6x6x32xbf16, #tpu.memory_space<vmem>>, vector<1x6x32xbf16>,
    %c5 = arith.constant 5 : index
    %c0_64 = arith.constant 0 : index
    %c0_65 = arith.constant 0 : index
    %51 = vector.load %arg9[%c5, %c0_64, %c0_65] : memref<6x6x32xbf16, #tpu.memory_space<vmem>>, vector<1x6x32xbf16>
    tpu.vector_store %arg9[%c5, %c0_64, %c0_65], %49 {strides = array<i32>} : memref<6x6x32xbf16, #tpu.memory_space<vmem>>, vector<1x6x32xbf16>,
    %cst_66 = arith.constant 0.000000e+00 : bf16
    %52 = vector.broadcast %cst_66 : bf16 to vector<6x1x32xbf16>
    %c0_67 = arith.constant 0 : index
    %c0_68 = arith.constant 0 : index
    %c0_69 = arith.constant 0 : index
    %53 = vector.load %arg9[%c0_67, %c0_68, %c0_69] : memref<6x6x32xbf16, #tpu.memory_space<vmem>>, vector<6x1x32xbf16>
    tpu.vector_store %arg9[%c0_67, %c0_68, %c0_69], %52 {strides = array<i32>} : memref<6x6x32xbf16, #tpu.memory_space<vmem>>, vector<6x1x32xbf16>,
    %c0_70 = arith.constant 0 : index
    %c5_71 = arith.constant 5 : index
    %c0_72 = arith.constant 0 : index
    %54 = vector.load %arg9[%c0_70, %c5_71, %c0_72] : memref<6x6x32xbf16, #tpu.memory_space<vmem>>, vector<6x1x32xbf16>
    tpu.vector_store %arg9[%c0_70, %c5_71, %c0_72], %52 {strides = array<i32>} : memref<6x6x32xbf16, #tpu.memory_space<vmem>>, vector<6x1x32xbf16>,
    %55 = vector.shape_cast %47 : vector<16x32xf32> to vector<4x4x32xf32>
    %56 = arith.truncf %55 : vector<4x4x32xf32> to vector<4x4x32xbf16>
    %c1_73 = arith.constant 1 : index
    %c1_74 = arith.constant 1 : index
    %c0_75 = arith.constant 0 : index
    %57 = vector.load %arg9[%c1_73, %c1_74, %c0_75] : memref<6x6x32xbf16, #tpu.memory_space<vmem>>, vector<4x4x32xbf16>
    tpu.vector_store %arg9[%c1_73, %c1_74, %c0_75], %56 {strides = array<i32>} : memref<6x6x32xbf16, #tpu.memory_space<vmem>>, vector<4x4x32xbf16>,
    %c0_76 = arith.constant 0 : index
    %c0_77 = arith.constant 0 : index
    %c0_78 = arith.constant 0 : index
    %58 = vector.load %arg9[%c0_76, %c0_77, %c0_78] : memref<6x6x32xbf16, #tpu.memory_space<vmem>>, vector<4x4x32xbf16>
    %59 = vector.shape_cast %58 : vector<4x4x32xbf16> to vector<16x32xbf16>
    %c0_79 = arith.constant 0 : index
    %c0_80 = arith.constant 0 : index
    %60 = vector.load %arg10[%c0_79, %c0_80] : memref<16x288xbf16, #tpu.memory_space<vmem>>, vector<16x32xbf16>
    tpu.vector_store %arg10[%c0_79, %c0_80], %59 {strides = array<i32>} : memref<16x288xbf16, #tpu.memory_space<vmem>>, vector<16x32xbf16>,
    %c0_81 = arith.constant 0 : index
    %c1_82 = arith.constant 1 : index
    %c0_83 = arith.constant 0 : index
    %61 = vector.load %arg9[%c0_81, %c1_82, %c0_83] : memref<6x6x32xbf16, #tpu.memory_space<vmem>>, vector<4x4x32xbf16>
    %62 = vector.shape_cast %61 : vector<4x4x32xbf16> to vector<16x32xbf16>
    %c0_84 = arith.constant 0 : index
    %c32_85 = arith.constant 32 : index
    %63 = vector.load %arg10[%c0_84, %c32_85] : memref<16x288xbf16, #tpu.memory_space<vmem>>, vector<16x32xbf16>
    tpu.vector_store %arg10[%c0_84, %c32_85], %62 {strides = array<i32>} : memref<16x288xbf16, #tpu.memory_space<vmem>>, vector<16x32xbf16>,
    %c0_86 = arith.constant 0 : index
    %c2_87 = arith.constant 2 : index
    %c0_88 = arith.constant 0 : index
    %64 = vector.load %arg9[%c0_86, %c2_87, %c0_88] : memref<6x6x32xbf16, #tpu.memory_space<vmem>>, vector<4x4x32xbf16>
    %65 = vector.shape_cast %64 : vector<4x4x32xbf16> to vector<16x32xbf16>
    %c0_89 = arith.constant 0 : index
    %c64_90 = arith.constant 64 : index
    %66 = vector.load %arg10[%c0_89, %c64_90] : memref<16x288xbf16, #tpu.memory_space<vmem>>, vector<16x32xbf16>
    tpu.vector_store %arg10[%c0_89, %c64_90], %65 {strides = array<i32>} : memref<16x288xbf16, #tpu.memory_space<vmem>>, vector<16x32xbf16>,
    %c1_91 = arith.constant 1 : index
    %c0_92 = arith.constant 0 : index
    %c0_93 = arith.constant 0 : index
    %67 = vector.load %arg9[%c1_91, %c0_92, %c0_93] : memref<6x6x32xbf16, #tpu.memory_space<vmem>>, vector<4x4x32xbf16>
    %68 = vector.shape_cast %67 : vector<4x4x32xbf16> to vector<16x32xbf16>
    %c0_94 = arith.constant 0 : index
    %c96_95 = arith.constant 96 : index
    %69 = vector.load %arg10[%c0_94, %c96_95] : memref<16x288xbf16, #tpu.memory_space<vmem>>, vector<16x32xbf16>
    tpu.vector_store %arg10[%c0_94, %c96_95], %68 {strides = array<i32>} : memref<16x288xbf16, #tpu.memory_space<vmem>>, vector<16x32xbf16>,
    %c1_96 = arith.constant 1 : index
    %c1_97 = arith.constant 1 : index
    %c0_98 = arith.constant 0 : index
    %70 = vector.load %arg9[%c1_96, %c1_97, %c0_98] : memref<6x6x32xbf16, #tpu.memory_space<vmem>>, vector<4x4x32xbf16>
    %71 = vector.shape_cast %70 : vector<4x4x32xbf16> to vector<16x32xbf16>
    %c0_99 = arith.constant 0 : index
    %c128_100 = arith.constant 128 : index
    %72 = vector.load %arg10[%c0_99, %c128_100] : memref<16x288xbf16, #tpu.memory_space<vmem>>, vector<16x32xbf16>
    tpu.vector_store %arg10[%c0_99, %c128_100], %71 {strides = array<i32>} : memref<16x288xbf16, #tpu.memory_space<vmem>>, vector<16x32xbf16>,
    %c1_101 = arith.constant 1 : index
    %c2_102 = arith.constant 2 : index
    %c0_103 = arith.constant 0 : index
    %73 = vector.load %arg9[%c1_101, %c2_102, %c0_103] : memref<6x6x32xbf16, #tpu.memory_space<vmem>>, vector<4x4x32xbf16>
    %74 = vector.shape_cast %73 : vector<4x4x32xbf16> to vector<16x32xbf16>
    %c0_104 = arith.constant 0 : index
    %c160 = arith.constant 160 : index
    %75 = vector.load %arg10[%c0_104, %c160] : memref<16x288xbf16, #tpu.memory_space<vmem>>, vector<16x32xbf16>
    tpu.vector_store %arg10[%c0_104, %c160], %74 {strides = array<i32>} : memref<16x288xbf16, #tpu.memory_space<vmem>>, vector<16x32xbf16>,
    %c2_105 = arith.constant 2 : index
    %c0_106 = arith.constant 0 : index
    %c0_107 = arith.constant 0 : index
    %76 = vector.load %arg9[%c2_105, %c0_106, %c0_107] : memref<6x6x32xbf16, #tpu.memory_space<vmem>>, vector<4x4x32xbf16>
    %77 = vector.shape_cast %76 : vector<4x4x32xbf16> to vector<16x32xbf16>
    %c0_108 = arith.constant 0 : index
    %c192 = arith.constant 192 : index
    %78 = vector.load %arg10[%c0_108, %c192] : memref<16x288xbf16, #tpu.memory_space<vmem>>, vector<16x32xbf16>
    tpu.vector_store %arg10[%c0_108, %c192], %77 {strides = array<i32>} : memref<16x288xbf16, #tpu.memory_space<vmem>>, vector<16x32xbf16>,
    %c2_109 = arith.constant 2 : index
    %c1_110 = arith.constant 1 : index
    %c0_111 = arith.constant 0 : index
    %79 = vector.load %arg9[%c2_109, %c1_110, %c0_111] : memref<6x6x32xbf16, #tpu.memory_space<vmem>>, vector<4x4x32xbf16>
    %80 = vector.shape_cast %79 : vector<4x4x32xbf16> to vector<16x32xbf16>
    %c0_112 = arith.constant 0 : index
    %c224 = arith.constant 224 : index
    %81 = vector.load %arg10[%c0_112, %c224] : memref<16x288xbf16, #tpu.memory_space<vmem>>, vector<16x32xbf16>
    tpu.vector_store %arg10[%c0_112, %c224], %80 {strides = array<i32>} : memref<16x288xbf16, #tpu.memory_space<vmem>>, vector<16x32xbf16>,
    %c2_113 = arith.constant 2 : index
    %c2_114 = arith.constant 2 : index
    %c0_115 = arith.constant 0 : index
    %82 = vector.load %arg9[%c2_113, %c2_114, %c0_115] : memref<6x6x32xbf16, #tpu.memory_space<vmem>>, vector<4x4x32xbf16>
    %83 = vector.shape_cast %82 : vector<4x4x32xbf16> to vector<16x32xbf16>
    %c0_116 = arith.constant 0 : index
    %c256 = arith.constant 256 : index
    %84 = vector.load %arg10[%c0_116, %c256] : memref<16x288xbf16, #tpu.memory_space<vmem>>, vector<16x32xbf16>
    tpu.vector_store %arg10[%c0_116, %c256], %83 {strides = array<i32>} : memref<16x288xbf16, #tpu.memory_space<vmem>>, vector<16x32xbf16>,
    %c0_117 = arith.constant 0 : index
    %c0_118 = arith.constant 0 : index
    %85 = vector.load %arg10[%c0_117, %c0_118] : memref<16x288xbf16, #tpu.memory_space<vmem>>, vector<16x288xbf16>
    %c0_119 = arith.constant 0 : index
    %c0_120 = arith.constant 0 : index
    %86 = vector.load %arg5[%c0_119, %c0_120] : memref<288x32xbf16, #tpu.memory_space<vmem>>, vector<288x32xbf16>
    %cst_121 = arith.constant dense<0.000000e+00> : vector<16x32xf32>
    %87 = tpu.matmul %85, %86, %cst_121 {dimension_numbers = #tpu.dot_dimension_numbers<[1], [0], [0], [1], [0, 0, 1, 1], [], []>} : vector<16x288xbf16>, vector<288x32xbf16>, vector<16x32xf32> -> vector<16x32xf32>
    %c0_122 = arith.constant 0 : index
    %c0_123 = arith.constant 0 : index
    %88 = vector.load %arg6[%c0_122, %c0_123] : memref<1x32xf32, #tpu.memory_space<vmem>>, vector<1x32xf32>
    %89 = vector.broadcast %88 : vector<1x32xf32> to vector<16x32xf32>
    %90 = arith.mulf %87, %89 : vector<16x32xf32>
    %c0_124 = arith.constant 0 : index
    %c0_125 = arith.constant 0 : index
    %91 = vector.load %arg7[%c0_124, %c0_125] : memref<1x32xf32, #tpu.memory_space<vmem>>, vector<1x32xf32>
    %92 = vector.broadcast %91 : vector<1x32xf32> to vector<16x32xf32>
    %93 = arith.addf %90, %92 : vector<16x32xf32>
    %94 = arith.addf %93, %48 : vector<16x32xf32>
    %cst_126 = arith.constant 0.000000e+00 : f32
    %95 = vector.broadcast %cst_126 : f32 to vector<16x32xf32>
    %96 = arith.maximumf %94, %95 : vector<16x32xf32>
    %97 = vector.shape_cast %96 : vector<16x32xf32> to vector<1x16x32xf32>
    %98 = arith.truncf %97 : vector<1x16x32xf32> to vector<1x16x32xbf16>
    %c0_127 = arith.constant 0 : index
    %c0_128 = arith.constant 0 : index
    %c0_129 = arith.constant 0 : index
    %99 = vector.load %arg8[%c0_127, %c0_128, %c0_129] : memref<1x16x32xbf16, #tpu.memory_space<vmem>>, vector<1x16x32xbf16>
    tpu.vector_store %arg8[%c0_127, %c0_128, %c0_129], %98 {strides = array<i32>} : memref<1x16x32xbf16, #tpu.memory_space<vmem>>, vector<1x16x32xbf16>,
    return
  }
  func.func @transform_0(%arg0: i32) -> (i32, i32, i32, i32, i32) {
    %c0_i32 = arith.constant 0 : i32
    %c0_i32_0 = arith.constant 0 : i32
    %c0_i32_1 = arith.constant 0 : i32
    %c0_i32_2 = arith.constant 0 : i32
    %c0_i32_3 = arith.constant 0 : i32
    return %arg0, %c0_i32, %c0_i32_0, %c0_i32_1, %c0_i32_2 : i32, i32, i32, i32, i32
  }
  func.func @transform_1(%arg0: i32) -> (i32, i32) {
    %c0_i32 = arith.constant 0 : i32
    %c0_i32_0 = arith.constant 0 : i32
    %c0_i32_1 = arith.constant 0 : i32
    return %c0_i32, %c0_i32_0 : i32, i32
  }
  func.func @transform_2(%arg0: i32) -> (i32, i32) {
    %c0_i32 = arith.constant 0 : i32
    %c0_i32_0 = arith.constant 0 : i32
    %c0_i32_1 = arith.constant 0 : i32
    return %c0_i32, %c0_i32_0 : i32, i32
  }
  func.func @transform_3(%arg0: i32) -> (i32, i32) {
    %c0_i32 = arith.constant 0 : i32
    %c0_i32_0 = arith.constant 0 : i32
    %c0_i32_1 = arith.constant 0 : i32
    return %c0_i32, %c0_i32_0 : i32, i32
  }
  func.func @transform_4(%arg0: i32) -> (i32, i32) {
    %c0_i32 = arith.constant 0 : i32
    %c0_i32_0 = arith.constant 0 : i32
    %c0_i32_1 = arith.constant 0 : i32
    return %c0_i32, %c0_i32_0 : i32, i32
  }
  func.func @transform_5(%arg0: i32) -> (i32, i32) {
    %c0_i32 = arith.constant 0 : i32
    %c0_i32_0 = arith.constant 0 : i32
    %c0_i32_1 = arith.constant 0 : i32
    return %c0_i32, %c0_i32_0 : i32, i32
  }
  func.func @transform_6(%arg0: i32) -> (i32, i32) {
    %c0_i32 = arith.constant 0 : i32
    %c0_i32_0 = arith.constant 0 : i32
    %c0_i32_1 = arith.constant 0 : i32
    return %c0_i32, %c0_i32_0 : i32, i32
  }
  func.func @transform_7(%arg0: i32) -> (i32, i32, i32) {
    %c0_i32 = arith.constant 0 : i32
    %c0_i32_0 = arith.constant 0 : i32
    %c0_i32_1 = arith.constant 0 : i32
    return %arg0, %c0_i32, %c0_i32_0 : i32, i32, i32
  }
}

</mosaic_0001>

<bundles_post_ra>
// kernel: tpu_custom_call.1
= control target key start
LH: loop header
LB: loop body
LE: loop exit
PB: predicated region body
PF: predicated region fallthrough
CT: control target
= control target key end

     0   :  { %12 = vsyncpa [#allocation6], 0  ;;  %s2881_s0 = inlined_call_operand.vmem [shape: bf16[2,4,5,5,16], index: 0, kind: input, shape index: {}]   ;;  %s2882_s1 = inlined_call_operand.vmem [shape: bf16[144,64], index: 1, kind: input, shape index: {}]   ;;  %s2883_s2 = inlined_call_operand.vmem [shape: f32[1,64], index: 2, kind: input, shape index: {}]   ;;  %s2884_s3 = inlined_call_operand.vmem [shape: f32[1,64], index: 3, kind: input, shape index: {}]   ;;  %s2885_s4 = inlined_call_operand.vmem [shape: bf16[288,32], index: 4, kind: input, shape index: {}]   ;;  %s2886_s5 = inlined_call_operand.vmem [shape: f32[1,32], index: 5, kind: input, shape index: {}]   ;;  %s2887_s6 = inlined_call_operand.vmem [shape: f32[1,32], index: 6, kind: input, shape index: {}]   ;;  %s2888_s7 = inlined_call_operand.hbm [shape: bf16[2,16,32], index: 7, kind: output, shape index: {}]  }
   0x1   :  { %14 = vsyncpa [#allocation6 + $0x1], 0  ;;  %s2368_s24 = smov 0   ;;  %s2370_s25 = smov 0  }
   0x2   :  { %s2372_s26 = smov 0   ;;  %s2374_s27 = smov 0  }
   0x3 LB: > { %s2389_s28 = sadd.s32 4294967295, %s2317_s27   ;;  %s1976_s29 = sadd.s32 4294967294, %s2317_s27   ;;  %s2317_s27 = sphi %s2374_s27, %s2908_s27   ;;  %s2313_s26 = sphi %s2372_s26, %s2907_s26   ;;  %s2309_s25 = sphi %s2370_s25, %s2906_s25   ;;  %s2305_s24 = sphi %s2368_s24, %s2905_s24  }
   0x4   : > { %s2393_s30 = sadd.s32 1, %s2317_s27   ;;  %s179_s8 = sadd.s32 1, %s2313_s26 }
   0x5   : > { %s176_s9 = ssub.s32 %s2317_s27, %s2393_s30  ;;  %p189_p0 = scmp.ne.s32.totalorder %s2313_s26, %s2309_s25 }
   0x6   : > { %p177_p1 = scmp.eq.s32.totalorder %s176_s9, 0  ;;  %p190_p2 = scmp.eq.s32.totalorder %s2389_s28, 1 }
   0x7   : > { %p195_p3 = scmp.ne.s32.totalorder %s2309_s25, %s2305_s24  ;;  %p196_p4 = scmp.eq.s32.totalorder %s1976_s29, 1 }
   0x8   : > { %s2404_s10 = scalar_select %p177_p1, %s2313_s26, %s179_s8  }
   0x9   : > { %p2406_p5 = por %p190_p2, %p189_p0  ;;  %p2410_p6 = por %p196_p4, %p195_p3 }
   0xa   : > { %p1979_p7 = scmp.ge.s32.totalorder %s2317_s27, 1  ;;  %p240_p8 = scmp.lt.s32.totalorder %s2317_s27, 3 }
   0xc   : > { %p241_p9 = pnand %p1979_p7, %p240_p8 }
   0xd   : > { %p272_p10 = scmp.lt.s32.totalorder (!%p241_p9), %s2389_s28, 1  ;;  %s2319_s18 = smov (!%p241_p9), 16  }
   0xe   : > { %244 = sbr.rel (%p241_p9) target bundleno = 746 (0x2ea), region = 48  ;;  %s2320_s19 = smov (!%p241_p9), 32  }
   0xf   : > { %s2321_s20 = smov (!%p241_p9), 48   ;;  %s2322_s21 = smov (!%p241_p9), 64  }
  0x10   : > { %s2323_s22 = smov (!%p241_p9), 80   ;;  %s2324_s23 = smov (!%p241_p9), 96  }
  0x11   : > { %s2325_s29 = smov (!%p241_p9), 112   ;;  %s269_s9 = sand.u32 (!%p241_p9), 1, %s2309_s25  }
  0x13   : > { %s273_s13 = scalar_select %p272_p10, %s2389_s28, 1  ;;  %vm341_vm0 = vcmask 1041408   ;;  %vm345_vm1 = vcmask 1043458   ;;  %vm367_vm2 = vsmask.f32 1280  ;;  %vm297_vm9 = vcmask 125952  }
  0x14   : > { %vm368_vm3 = vsmask.f32 3336  ;;  %vm370_vm4 = vsmask.f32 5392  ;;  %vm372_vm5 = vsmask.f32 7448 }
  0x15   : > { %s2202_s14 = smul.u32 80, %s273_s13  ;;  %vm2438_vm6 = vmor %vm367_vm2, %vm368_vm3  ;;  %vm326_vm10 = vcmask 257152   ;;  %vm447_vm11 = vcmask 388352   ;;  %vm476_vm12 = vcmask 519552   ;;  %vm505_vm13 = vcmask 650752   ;;  %s1980_s13 = sshll.u32 %s269_s9, 3 }
  0x16   : > { %vm2452_vm7 = vmor %vm2438_vm6, %vm370_vm4  ;;  %vm617_vm14 = vcmask 781952   ;;  %vm866_vm15 = vcmask 130048   ;;  %vm646_vm2 = vcmask 913152   ;;  %vm675_vm3 = vcmask 1044352  }
  0x17   : > { %s2421_s17 = scalar_lea.vmem %s2881_s0, %s2202_s14  ;;  %vm2463_vm8 = vmor %vm2452_vm7, %vm372_vm5  ;;  %vm916_vm4 = vcmask 253952   ;;  %vm917_vm5 = vsmask.f32 256  ;;  %vm937_vm6 = vcmask 256002   ;;  %vm938_vm7 = vsmask.f32 7946 }
  0x18   : > { %v278_v0 = vld [vmem:[%s2421_s17] sm:$0x3]  ;;  %v279_v1 = vld [vmem:[%s2421_s17 + $0x4] sm:$0x3]  ;;  %v280_v6 = vld [vmem:[%s2421_s17 + $0x8] sm:$0x3] }
  0x19   : > { %283 = vst [vmem:[#allocation1] ss:$2 sm:$0xff] %v278_v0  ;;  %v329_v2 = vld [vmem:[%s2421_s17] sm:$0x7]  ;;  %v330_v3 = vld [vmem:[%s2421_s17 + $0x4] sm:$0x7] }
  0x1a   : > { %286 = vst [vmem:[#allocation1 + $0x1] ss:$2 sm:$0xff] %v279_v1  ;;  %v337_v4 = vrot.slane %v329_v2, 2  ;;  %v338_v5 = vrot.slane %v330_v3, 2  ;;  %v281_v7 = vld [vmem:[%s2421_s17 + $0xc] sm:$0x3] }
  0x1b   : > { %289 = vst [vmem:[#allocation1 + $0x10] ss:$2 sm:$0xff] %v280_v6  ;;  %v331_v14 = vld [vmem:[%s2421_s17 + $0x8] sm:$0x7]  ;;  %v332_v19 = vld [vmem:[%s2421_s17 + $0xc] sm:$0x7] }
  0x1c   : > { %v344_v8 = vsel %vm341_vm0, %v329_v2, %v337_v4  ;;  %v346_v9 = vsel %vm345_vm1, %v329_v2, %v337_v4  ;;  %v351_v11 = vsel %vm341_vm0, %v330_v3, %v338_v5  ;;  %v352_v12 = vsel %vm345_vm1, %v330_v3, %v338_v5  ;;  %292 = vst [vmem:[#allocation1 + $0x11] ss:$2 sm:$0xff] %v281_v7  ;;  %v1982_v20 = vld [vmem:[%s2421_s17 + $0x14] sm:$0x3]  ;;  %v1983_v26 = vld [vmem:[%s2421_s17 + $0x18] sm:$0x3] }
  0x1d   : > { %v348_v10 = vrot.slane %v346_v9, 2  ;;  %v374_v13 = vshrl.u32 %v344_v8, 16  ;;  %v354_v15 = vrot.slane %v352_v12, 2  ;;  %v377_v16 = vshll.u32 %v344_v8, 16  ;;  %v1984_v32 = vld [vmem:[%s2421_s17 + $0x1c] sm:$0x3] }
  0x1e   : > { %v387_v17 = vshrl.u32 %v351_v11, 16  ;;  %v390_v18 = vshll.u32 %v351_v11, 16  ;;  %v339_v24 = vrot.slane %v331_v14, 2  ;;  %v340_v25 = vrot.slane %v332_v19, 2  ;;  %v1985_v40 = vld [vmem:[%s2421_s17 + $0x20] sm:$0x3] }
  0x1f   : > { %v376_v22 = vrot.slane %v374_v13, 6  ;;  %v383_v23 = vshll.u32 %v348_v10, 16  ;;  %v379_v27 = vrot.slane %v377_v16, 7  ;;  %v396_v30 = vshll.u32 %v354_v15, 16  ;;  %v1994_v0 = vld [vmem:[%s2421_s17 + $0x28] sm:$0x7] }
  0x20   : > { %v389_v28 = vrot.slane %v387_v17, 6  ;;  %v392_v29 = vrot.slane %v390_v18, 7  ;;  %v357_v33 = vsel %vm341_vm0, %v331_v14, %v339_v24  ;;  %v358_v34 = vsel %vm345_vm1, %v331_v14, %v339_v24  ;;  %v1996_v5 = vld [vmem:[%s2421_s17 + $0x30] sm:$0x7]  ;;  %v1997_v6 = vld [vmem:[%s2421_s17 + $0x34] sm:$0x7] }
  0x21   : > { %v2443_v31 = vld.sshfl [vmem:[#allocation1] sm:$0xff pattern:$0x75643120]  ;;  %v363_v35 = vsel %vm341_vm0, %v332_v19, %v340_v25  ;;  %v380_v37 = vor.u32 %v379_v27, %v376_v22  ;;  %v385_v38 = vrot.slane %v383_v23, 7  ;;  %v360_v41 = vrot.slane %v358_v34, 2  ;;  %s2201_s14 = sshll.u32 %s2389_s28, 3 }
  0x22   : > { %306 = vst [vmem:[#allocation1] ss:$2 sm:$0xff] %v1982_v20  ;;  %v393_v39 = vor.u32 %v392_v29, %v389_v28  ;;  %v364_v42 = vsel %vm345_vm1, %v332_v19, %v340_v25  ;;  %v400_v43 = vshrl.u32 %v357_v33, 16  ;;  %v403_v44 = vshll.u32 %v357_v33, 16  ;;  %v1995_v8 = vld [vmem:[%s2421_s17 + $0x2c] sm:$0x7] }
  0x23   : > { %309 = vst [vmem:[#allocation1 + $0x1] ss:$2 sm:$0xff] %v1983_v26  ;;  %v413_v45 = vshrl.u32 %v363_v35, 16  ;;  %v381_v46 = vrot.slane %v380_v37, 2  ;;  %v398_v47 = vrot.slane %v396_v30, 7  ;;  %v366_v49 = vrot.slane %v364_v42, 2 }
  0x24   : > { %v2458_v48 = vld.sshfl [vmem:[#allocation1 + $0x10] sm:$0xff pattern:$0x75643120]  ;;  %v394_v51 = vrot.slane %v393_v39, 2  ;;  %v402_v52 = vrot.slane %v400_v43, 6  ;;  %v405_v53 = vrot.slane %v403_v44, 7 }
  0x25   : > { %312 = vst [vmem:[#allocation1 + $0x10] ss:$2 sm:$0xff] %v1984_v32  ;;  %v409_v54 = vshll.u32 %v360_v41, 16  ;;  %v415_v55 = vrot.slane %v413_v45, 6  ;;  %v416_v56 = vshll.u32 %v363_v35, 16  ;;  %v422_v57 = vshll.u32 %v366_v49, 16 }
  0x26   : > { %315 = vst [vmem:[#allocation1 + $0x11] ss:$2 sm:$0xff] %v1985_v40  ;;  %v406_v58 = vor.u32 %v405_v53, %v402_v52  ;;  %v386_v60 = vsel %vm2463_vm8, %v381_v46, %v385_v38  ;;  %v399_v62 = vsel %vm2463_vm8, %v394_v51, %v398_v47  ;;  %v516_v9 = vrot.slane %v1994_v0, 2  ;;  %v1986_v16 = vld [vmem:[%s2421_s17 + $0x28] sm:$0x3]  ;;  %s1899_s28 = scalar_lea.sflag [#allocation6], %s269_s9 }
  0x27   : > { %v411_v59 = vrot.slane %v409_v54, 7  ;;  %v418_v61 = vrot.slane %v416_v56, 7  ;;  %v424_v3 = vrot.slane %v422_v57, 7  ;;  %v518_v12 = vrot.slane %v1996_v5, 2  ;;  %v1987_v18 = vld [vmem:[%s2421_s17 + $0x2c] sm:$0x3] }
  0x28   : > { %v407_v63 = vrot.slane %v406_v58, 2  ;;  %v519_v13 = vrot.slane %v1997_v6, 2  ;;  %v517_v14 = vrot.slane %v1995_v8, 2  ;;  %v522_v15 = vsel %vm341_vm0, %v1994_v0, %v516_v9  ;;  %v1988_v24 = vld [vmem:[%s2421_s17 + $0x30] sm:$0x3] }
  0x29   : > { %v419_v2 = vor.u32 %v418_v61, %v415_v55  ;;  %v534_v20 = vsel %vm341_vm0, %v1996_v5, %v518_v12  ;;  %v544_v22 = vshrl.u32 %v522_v15, 16  ;;  %v547_v23 = vshll.u32 %v522_v15, 16  ;;  %v1989_v27 = vld [vmem:[%s2421_s17 + $0x34] sm:$0x3]  ;;  %v1990_v44 = vld [vmem:[%s2421_s17 + $0x3c] sm:$0x3] }
  0x2a   : > { %v316_v1 = vld.sshfl [vmem:[#allocation1] sm:$0xff pattern:$0x75643120]  ;;  %v412_v4 = vsel %vm2463_vm8, %v407_v63, %v411_v59  ;;  %v528_v17 = vsel %vm341_vm0, %v1995_v8, %v517_v14  ;;  %v540_v21 = vsel %vm341_vm0, %v1997_v6, %v519_v13  ;;  %v523_v25 = vsel %vm345_vm1, %v1994_v0, %v516_v9  ;;  %298 = vst.msk [vmem:[#allocation4] sm:$0xf] %vm297_vm9, %v2443_v31 }
  0x2b   : > { %320 = vrot.lane.b32.xlu0 %v316_v1, %s2319_s18  ;;  %427 = vst [vmem:[#allocation1] ss:$2 sm:$0xff] %v386_v60  ;;  %v420_v7 = vrot.slane %v419_v2, 2  ;;  %v557_v26 = vshrl.u32 %v528_v17, 16  ;;  %v535_v28 = vsel %vm345_vm1, %v1996_v5, %v518_v12  ;;  %v529_v29 = vsel %vm345_vm1, %v1995_v8, %v517_v14  ;;  %v1991_v51 = vld [vmem:[%s2421_s17 + $0x40] sm:$0x3] }
  0x2c   : > { %430 = vst [vmem:[#allocation1 + $0x1] ss:$2 sm:$0xff] %v399_v62  ;;  %v560_v30 = vshll.u32 %v528_v17, 16  ;;  %v541_v33 = vsel %vm345_vm1, %v1997_v6, %v519_v13  ;;  %v570_v34 = vshrl.u32 %v534_v20, 16  ;;  %v573_v35 = vshll.u32 %v534_v20, 16 }
  0x2d   : > { %v318_v10 = vld.sshfl [vmem:[#allocation1 + $0x10] sm:$0xff pattern:$0x75643120]  ;;  %v425_v11 = vsel %vm2463_vm8, %v420_v7, %v424_v3  ;;  %v583_v36 = vshrl.u32 %v540_v21, 16  ;;  %v586_v37 = vshll.u32 %v540_v21, 16  ;;  %v525_v38 = vrot.slane %v523_v25, 2 }
  0x2e   : > { %433 = vst [vmem:[#allocation1 + $0x10] ss:$2 sm:$0xff] %v412_v4  ;;  %v546_v39 = vrot.slane %v544_v22, 6  ;;  %v549_v40 = vrot.slane %v547_v23, 7  ;;  %v531_v41 = vrot.slane %v529_v29, 2  ;;  %v559_v42 = vrot.slane %v557_v26, 6 }
  0x2f   : > { %436 = vst [vmem:[#allocation1 + $0x11] ss:$2 sm:$0xff] %v425_v11  ;;  %v562_v43 = vrot.slane %v560_v30, 7  ;;  %v537_v45 = vrot.slane %v535_v28, 2  ;;  %v543_v46 = vrot.slane %v541_v33, 2  ;;  %v572_v47 = vrot.slane %v570_v34, 6 }
  0x30   : > { %v575_v49 = vrot.slane %v573_v35, 7  ;;  %v585_v52 = vrot.slane %v583_v36, 6  ;;  %v588_v53 = vrot.slane %v586_v37, 7  ;;  %v550_v54 = vor.u32 %v549_v40, %v546_v39  ;;  %v1992_v59 = vld [vmem:[%s2421_s17 + $0x44] sm:$0x3] }
  0x31   : > { %v553_v55 = vshll.u32 %v525_v38, 16  ;;  %v563_v57 = vor.u32 %v562_v43, %v559_v42  ;;  %v566_v58 = vshll.u32 %v531_v41, 16  ;;  %v1993_v60 = vld [vmem:[%s2421_s17 + $0x48] sm:$0x3]  ;;  %v579_v62 = vshll.u32 %v537_v45, 16 }
  0x32   : > { %v576_v61 = vor.u32 %v575_v49, %v572_v47  ;;  %v589_v0 = vor.u32 %v588_v53, %v585_v52  ;;  %v592_v1 = vshll.u32 %v543_v46, 16  ;;  %v551_v2 = vrot.slane %v550_v54, 2  ;;  %v2006_v12 = vld [vmem:[%s2421_s17 + $0x4] sm:$0x7]  ;;  %v2007_v14 = vld [vmem:[%s2421_s17 + $0x8] sm:$0x7] }
  0x33   : > { %v437_v19 = vld.sshfl [vmem:[#allocation1] sm:$0xff pattern:$0x75643120]  ;;  %322 = vrot.lane.b32.xlu0 %v318_v10, %s2319_s18  ;;  %v555_v3 = vrot.slane %v553_v55, 7  ;;  %v564_v4 = vrot.slane %v563_v57, 2  ;;  %v568_v5 = vrot.slane %v566_v58, 7 }
  0x34   : > { %441 = vrot.lane.b32.xlu1 %v437_v19, %s2320_s19  ;;  %456 = vst [vmem:[#allocation1] ss:$2 sm:$0xff] %v1986_v16  ;;  %v577_v6 = vrot.slane %v576_v61, 2  ;;  %v581_v7 = vrot.slane %v579_v62, 7  ;;  %v590_v8 = vrot.slane %v589_v0, 2  ;;  %v594_v9 = vrot.slane %v592_v1, 7 }
  0x35   : > { %459 = vst [vmem:[#allocation1 + $0x1] ss:$2 sm:$0xff] %v1987_v18  ;;  %v556_v10 = vsel %vm2463_vm8, %v551_v2, %v555_v3  ;;  %v569_v11 = vsel %vm2463_vm8, %v564_v4, %v568_v5  ;;  %v2008_v16 = vld [vmem:[%s2421_s17 + $0xc] sm:$0x7]  ;;  %v2009_v18 = vld [vmem:[%s2421_s17 + $0x10] sm:$0x7] }
  0x36   : > { %v439_v32 = vld.sshfl [vmem:[#allocation1 + $0x10] sm:$0xff pattern:$0x75643120]  ;;  %v582_v15 = vsel %vm2463_vm8, %v577_v6, %v581_v7  ;;  %v595_v17 = vsel %vm2463_vm8, %v590_v8, %v594_v9  ;;  %v686_v19 = vrot.slane %v2006_v12, 2  ;;  %v687_v21 = vrot.slane %v2007_v14, 2 }
  0x37   : > { %462 = vst [vmem:[#allocation1 + $0x10] ss:$2 sm:$0xff] %v1988_v24  ;;  %v688_v22 = vrot.slane %v2008_v16, 2  ;;  %v689_v23 = vrot.slane %v2009_v18, 2  ;;  %v1998_v25 = vld [vmem:[%s2421_s17 + $0x4] sm:$0x3] }
  0x38   : > { %465 = vst [vmem:[#allocation1 + $0x11] ss:$2 sm:$0xff] %v1989_v27  ;;  %v692_v24 = vsel %vm341_vm0, %v2006_v12, %v686_v19  ;;  %v698_v26 = vsel %vm341_vm0, %v2007_v14, %v687_v21  ;;  %v1999_v27 = vld [vmem:[%s2421_s17 + $0x8] sm:$0x3]  ;;  %v693_v28 = vsel %vm345_vm1, %v2006_v12, %v686_v19  ;;  %v2000_v33 = vld [vmem:[%s2421_s17 + $0xc] sm:$0x3]  ;;  %v699_v38 = vsel %vm345_vm1, %v2007_v14, %v687_v21 }
  0x39   : > { %299 = vst.msk [vmem:[#allocation4 + $0x8] sm:$0xf] %vm297_vm9, %v2458_v48  ;;  %v704_v29 = vsel %vm341_vm0, %v2008_v16, %v688_v22  ;;  %v714_v30 = vshrl.u32 %v692_v24, 16  ;;  %v710_v34 = vsel %vm341_vm0, %v2009_v18, %v689_v23  ;;  %v727_v35 = vshrl.u32 %v698_v26, 16  ;;  %v2001_v36 = vld [vmem:[%s2421_s17 + $0x10] sm:$0x3] }
  0x3a   : > { %v730_v48 = vshll.u32 %v698_v26, 16  ;;  %v695_v37 = vrot.slane %v693_v28, 2  ;;  %v705_v40 = vsel %vm345_vm1, %v2008_v16, %v688_v22  ;;  %v711_v41 = vsel %vm345_vm1, %v2009_v18, %v689_v23  ;;  %v2002_v53 = vld [vmem:[%s2421_s17 + $0x18] sm:$0x3]  ;;  %v2003_v58 = vld [vmem:[%s2421_s17 + $0x1c] sm:$0x3] }
  0x3b   : > { %v740_v42 = vshrl.u32 %v704_v29, 16  ;;  %v743_v43 = vshll.u32 %v704_v29, 16  ;;  %v753_v46 = vshrl.u32 %v710_v34, 16  ;;  %v756_v47 = vshll.u32 %v710_v34, 16  ;;  %v2004_v2 = vld [vmem:[%s2421_s17 + $0x20] sm:$0x3] }
  0x3c   : > { %443 = vrot.lane.b32.xlu1 %v439_v32, %s2320_s19  ;;  %v466_v56 = vld.sshfl [vmem:[#allocation1] sm:$0xff pattern:$0x75643120]  ;;  %v717_v32 = vshll.u32 %v692_v24, 16  ;;  %v701_v49 = vrot.slane %v699_v38, 2  ;;  %v732_v52 = vrot.slane %v730_v48, 7 }
  0x3d   : > { %485 = vst [vmem:[#allocation1] ss:$2 sm:$0xff] %v1990_v44  ;;  %470 = vrot.lane.b32.xlu2 %v466_v56, %s2321_s20  ;;  %v716_v44 = vrot.slane %v714_v30, 6  ;;  %v707_v54 = vrot.slane %v705_v40, 2  ;;  %v713_v55 = vrot.slane %v711_v41, 2  ;;  %v742_v56 = vrot.slane %v740_v42, 6 }
  0x3e   : > { %488 = vst [vmem:[#allocation1 + $0x1] ss:$2 sm:$0xff] %v1991_v51  ;;  %v719_v45 = vrot.slane %v717_v32, 7  ;;  %v729_v51 = vrot.slane %v727_v35, 6  ;;  %v745_v57 = vrot.slane %v743_v43, 7  ;;  %v755_v61 = vrot.slane %v753_v46, 6 }
  0x3f   : > { %v468_v63 = vld.sshfl [vmem:[#allocation1 + $0x10] sm:$0xff pattern:$0x75643120]  ;;  %v758_v62 = vrot.slane %v756_v47, 7  ;;  %v736_v1 = vshll.u32 %v701_v49, 16  ;;  %v749_v5 = vshll.u32 %v707_v54, 16 }
  0x40   : > { %491 = vst [vmem:[#allocation1 + $0x10] ss:$2 sm:$0xff] %v1992_v59  ;;  %v720_v59 = vor.u32 %v719_v45, %v716_v44  ;;  %v733_v0 = vor.u32 %v732_v52, %v729_v51  ;;  %v2005_v3 = vld [vmem:[%s2421_s17 + $0x24] sm:$0x3]  ;;  %v746_v4 = vor.u32 %v745_v57, %v742_v56  ;;  %v2177_v26 = vld [vmem:[%s2882_s1 + $0x30] sm:$0xff]  ;;  %v2172_v41 = vld [vmem:[%s2882_s1 + $0x8] sm:$0xff]  ;;  %s1910_s17 = scalar_lea.hbm %s2888_s7, %s2201_s14 }
  0x41   : > { %494 = vst [vmem:[#allocation1 + $0x11] ss:$2 sm:$0xff] %v1993_v60  ;;  %v723_v60 = vshll.u32 %v695_v37, 16  ;;  %v759_v9 = vor.u32 %v758_v62, %v755_v61  ;;  %v738_v12 = vrot.slane %v736_v1, 7  ;;  %v751_v14 = vrot.slane %v749_v5, 7  ;;  %v2179_v34 = vld [vmem:[%s2882_s1 + $0x40] sm:$0xff] }
  0x42   : > { %v721_v7 = vrot.slane %v720_v59, 2  ;;  %v2173_v48 = vld [vmem:[%s2882_s1 + $0x10] sm:$0xff]  ;;  %891 = vmatpush.bf16.msra.mxu1 %v2179_v34  ;;  %v2171_v43 = vld [vmem:[%s2882_s1] sm:$0xff]  ;;  %v922_v56 = vld [vmem:[#allocation2 + $0x4] sm:$0x1]  ;;  %s1913_s18 = sshll.u32 %s1910_s17, 4  ;;  %s1914_s18 = int_to_ptr.hbm [resolvable:$true] %s1913_s18 }
  0x43   : > { %v725_v8 = vrot.slane %v723_v60, 7  ;;  %v760_v16 = vrot.slane %v759_v9, 2  ;;  %v925_v57 = vld [vmem:[#allocation2 + $0x8] sm:$0x1]  ;;  %v943_v62 = vld [vmem:[#allocation2 + $0x4] sm:$0x4] }
  0x45   : > { %v495_v13 = vld.sshfl [vmem:[#allocation1] sm:$0xff pattern:$0x75643120]  ;;  %472 = vrot.lane.b32.xlu2 %v468_v63, %s2321_s20  ;;  %s2269_s20 = sshra.s32 %s1914_s18, 4  ;;  %s2270_s20 = int_to_ptr.hbm [resolvable:$true] %s2269_s20 }
  0x46   : > { %499 = vrot.lane.b32.xlu0 %v495_v13, %s2322_s21  ;;  %597 = vst [vmem:[#allocation1] ss:$2 sm:$0xff] %v556_v10  ;;  %v762_v10 = vshll.u32 %v713_v55, 16  ;;  %v747_v13 = vrot.slane %v746_v4, 2  ;;  %p2276_p0 = scmp.lt.s32.totalorder %s2270_s20, %s2888_s7 }
  0x47   : > { %600 = vst [vmem:[#allocation1 + $0x1] ss:$2 sm:$0xff] %v569_v11  ;;  %v734_v11 = vrot.slane %v733_v0, 2  ;;  %v946_v0 = vld [vmem:[#allocation2 + $0x8] sm:$0x4] }
  0x48   : > { %v497_v20 = vld.sshfl [vmem:[#allocation1 + $0x10] sm:$0xff pattern:$0x75643120] }
  0x49   : > { %501 = vrot.lane.b32.xlu1 %v497_v20, %s2322_s21  ;;  %603 = vst [vmem:[#allocation1 + $0x10] ss:$2 sm:$0xff] %v582_v15  ;;  %v726_v15 = vsel %vm2463_vm8, %v721_v7, %v725_v8  ;;  %v739_v18 = vsel %vm2463_vm8, %v734_v11, %v738_v12  ;;  %v752_v20 = vsel %vm2463_vm8, %v747_v13, %v751_v14  ;;  %v2251_v12 = vld [vmem:[%s2883_s2] ss:$0 sm:$0xff] }
  0x4a   : > { %606 = vst [vmem:[#allocation1 + $0x11] ss:$2 sm:$0xff] %v595_v17  ;;  %v764_v17 = vrot.slane %v762_v10, 7 }
  0x4c   : > { %v765_v21 = vsel %vm2463_vm8, %v760_v16, %v764_v17 }
  0x4e   : > { %v607_v31 = vld.sshfl [vmem:[#allocation1] sm:$0xff pattern:$0x75643120] }
  0x4f   : > { %626 = vst [vmem:[#allocation1] ss:$2 sm:$0xff] %v1998_v25  ;;  %611 = vrot.lane.b32.xlu2 %v607_v31, %s2323_s22  ;;  %v2178_v25 = vld [vmem:[%s2882_s1 + $0x38] sm:$0xff]  ;;  %v2175_v31 = vld [vmem:[%s2882_s1 + $0x20] sm:$0xff] }
  0x50   : > { %629 = vst [vmem:[#allocation1 + $0x1] ss:$2 sm:$0xff] %v1999_v27  ;;  %870 = vmatpush.bf16.msra.mxu0 %v2178_v25  ;;  %v2176_v27 = vld [vmem:[%s2882_s1 + $0x28] sm:$0xff] }
  0x51   : > { %v609_v39 = vld.sshfl [vmem:[#allocation1 + $0x10] sm:$0xff pattern:$0x75643120] }
  0x52   : > { %613 = vrot.lane.b32.xlu0 %v609_v39, %s2323_s22  ;;  %632 = vst [vmem:[#allocation1 + $0x10] ss:$2 sm:$0xff] %v2000_v33  ;;  %v2174_v33 = vld [vmem:[%s2882_s1 + $0x18] sm:$0xff]  ;;  %s2271_s22 = scalar_lea.hbm %s2270_s20, 8 }
  0x53   : > { %635 = vst [vmem:[#allocation1 + $0x11] ss:$2 sm:$0xff] %v2001_v36  ;;  %p2272_p11 = scmp.ne.s32.totalorder %s2270_s20, %s2271_s22 }
  0x54   : > { %871 = vmatpush.bf16.msra.mxu0 %v2177_v26 }
  0x55   : > { %p2273_p12 = pnand %p2272_p11, %p2406_p5 }
  0x57   : > { %v636_v63 = vld.sshfl [vmem:[#allocation1] sm:$0xff pattern:$0x75643120]  ;;  %p2274_p13 = pneg %p2273_p12 }
  0x58   : > { %640 = vrot.lane.b32.xlu1 %v636_v63, %s2324_s23  ;;  %655 = vst [vmem:[#allocation1] ss:$2 sm:$0xff] %v2002_v53  ;;  %872 = vmatpush.bf16.msra.mxu0 %v2176_v27 }
  0x59   : > { %658 = vst [vmem:[#allocation1 + $0x1] ss:$2 sm:$0xff] %v2003_v58  ;;  %v2326_v58 = vmov 0  }
  0x5a   : > { %v638_v6 = vld.sshfl [vmem:[#allocation1 + $0x10] sm:$0xff pattern:$0x75643120] }
  0x5b   : > { %661 = vst [vmem:[#allocation1 + $0x10] ss:$2 sm:$0xff] %v2004_v2  ;;  %642 = vrot.lane.b32.xlu2 %v638_v6, %s2324_s23 }
  0x5c   : > { %664 = vst [vmem:[#allocation1 + $0x11] ss:$2 sm:$0xff] %v2005_v3  ;;  %873 = vmatpush.bf16.msra.mxu0 %v2175_v31 }
  0x60   : > { %v665_v19 = vld.sshfl [vmem:[#allocation1] sm:$0xff pattern:$0x75643120]  ;;  %874 = vmatpush.bf16.msra.mxu0 %v2174_v33 }
  0x61   : > { %669 = vrot.lane.b32.xlu0 %v665_v19, %s2325_s29  ;;  %767 = vst [vmem:[#allocation1] ss:$2 sm:$0xff] %v726_v15  ;;  %v2252_v15 = vld [vmem:[%s2884_s3] ss:$0 sm:$0xff]  ;;  %v949_v19 = vld [vmem:[#allocation2 + $0xc] sm:$0x4] }
  0x62   : > { %770 = vst [vmem:[#allocation1 + $0x1] ss:$2 sm:$0xff] %v739_v18  ;;  %v928_v18 = vld [vmem:[#allocation2 + $0xc] sm:$0x1] }
  0x63   : > { %v667_v22 = vld.sshfl [vmem:[#allocation1 + $0x10] sm:$0xff pattern:$0x75643120] }
  0x64   : > { %671 = vrot.lane.b32.xlu1 %v667_v22, %s2325_s29  ;;  %773 = vst [vmem:[#allocation1 + $0x10] ss:$2 sm:$0xff] %v752_v20  ;;  %875 = vmatpush.bf16.msra.mxu0 %v2173_v48 }
  0x65   : > { %776 = vst [vmem:[#allocation1 + $0x11] ss:$2 sm:$0xff] %v765_v21 }
  0x68   : > { %876 = vmatpush.bf16.msra.mxu0 %v2172_v41 }
  0x69   : > { %v777_v24 = vld.sshfl [vmem:[#allocation1] sm:$0xff pattern:$0x75643120] }
  0x6a   : > { %781 = vst.msk [vmem:[#allocation4 + $0x4] sm:$0xf] %vm297_vm9, %v777_v24  ;;  %v931_v24 = vld [vmem:[#allocation2 + $0x10] sm:$0x1] }
  0x6c   : > { %v778_v23 = vld.sshfl [vmem:[#allocation1 + $0x10] sm:$0xff pattern:$0x75643120]  ;;  %877 = vmatpush.bf16.msra.mxu0 %v2171_v43 }
  0x6d   : > { %782 = vst.msk [vmem:[#allocation4 + $0xc] sm:$0xf] %vm297_vm9, %v778_v23  ;;  %vm912_vm9 = vcmask 256000  }
  0x6e   : > { %913 = vst.msk [vmem:[#allocation2] sm:$0x7] %vm912_vm9, %v2326_v58 }
  0x6f   : > { %915 = vst.msk [vmem:[#allocation2 + $0x14] sm:$0x7] %vm912_vm9, %v2326_v58 }
  0x71   : > { %v2169_v37 = vld [vmem:[#allocation4 + $0x4] sm:$0xf] }
  0x74   : > { %v2014_v38 = vld [vmem:[#allocation4 + $0x8] sm:$0xf0] }
  0x75   : > { %v2017_v40 = vor.u32 %v2169_v37, %v2014_v38  ;;  %v919_v2 = vld [vmem:[#allocation2] sm:$0x1]  ;;  %v940_v3 = vld [vmem:[#allocation2] sm:$0x4] }
  0x76   : > { %v934_v5 = vld [vmem:[#allocation2 + $0x14] sm:$0x1]  ;;  %v955_v7 = vld [vmem:[#allocation2 + $0x14] sm:$0x4] }
  0x77   : > { %2054 = vmatmul.msk.bf16.vlgmr.msra.gmra.mxu1 %vm866_vm15, %v2017_v40  ;;  %vm1191_vm15 = vcmask 1042434  }
  0x97   : > { %v471_v29 = vpop.permute.xlu2 %470 }
  0x9d   : > { %v321_v28 = vpop.permute.xlu0 %320 }
  0x9e   : > { %327 = vst.msk [vmem:[#allocation4] sm:$0xf] %vm326_vm10, %v321_v28 }
  0x9f   : > { %v473_v35 = vpop.permute.xlu2 %472 }
  0xa5   : > { %v323_v30 = vpop.permute.xlu0 %322 }
  0xa6   : > { %v442_v32 = vpop.permute.xlu1 %441  ;;  %328 = vst.msk [vmem:[#allocation4 + $0x8] sm:$0xf] %vm326_vm10, %v323_v30  ;;  %vm2572_vm10 = vmand %vm916_vm4, %vm917_vm5  ;;  %vm1195_vm4 = vcmask 1046534  }
  0xa7   : > { %448 = vst.msk [vmem:[#allocation4] sm:$0xf] %vm447_vm11, %v442_v32  ;;  %v923_v59 = vsel %vm2572_vm10, 0, %v922_v56  ;;  %v926_v60 = vsel %vm2572_vm10, 0, %v925_v57  ;;  %v920_v4 = vsel %vm2572_vm10, 0, %v919_v2  ;;  %v935_v8 = vsel %vm2572_vm10, 0, %v934_v5 }
  0xa8   : > { %477 = vst.msk [vmem:[#allocation4] sm:$0xf] %vm476_vm12, %v471_v29  ;;  %v929_v21 = vsel %vm2572_vm10, 0, %v928_v18  ;;  %v932_v27 = vsel %vm2572_vm10, 0, %v931_v24  ;;  %v952_v32 = vld [vmem:[#allocation2 + $0x10] sm:$0x4] }
  0xa9   : > { %v612_v39 = vpop.permute.xlu2 %611  ;;  %924 = vst [vmem:[#allocation2 + $0x4] sm:$0x1] %v923_v59 }
  0xaa   : > { %927 = vst [vmem:[#allocation2 + $0x8] sm:$0x1] %v926_v60 }
  0xab   : > { %921 = vst [vmem:[#allocation2] sm:$0x1] %v920_v4 }
  0xac   : > { %936 = vst [vmem:[#allocation2 + $0x14] sm:$0x1] %v935_v8 }
  0xad   : > { %930 = vst [vmem:[#allocation2 + $0xc] sm:$0x1] %v929_v21 }
  0xae   : > { %v444_v36 = vpop.permute.xlu1 %443  ;;  %933 = vst [vmem:[#allocation2 + $0x10] sm:$0x1] %v932_v27 }
  0xaf   : > { %449 = vst.msk [vmem:[#allocation4 + $0x8] sm:$0xf] %vm447_vm11, %v444_v36  ;;  %vm2581_vm11 = vmand %vm937_vm6, %vm938_vm7  ;;  %vm1035_vm7 = vcmask 257024  }
  0xb0   : > { %478 = vst.msk [vmem:[#allocation4 + $0x8] sm:$0xf] %vm476_vm12, %v473_v35  ;;  %v944_v63 = vsel %vm2581_vm11, 0, %v943_v62  ;;  %v947_v1 = vsel %vm2581_vm11, 0, %v946_v0  ;;  %v941_v6 = vsel %vm2581_vm11, 0, %v940_v3  ;;  %v956_v9 = vsel %vm2581_vm11, 0, %v955_v7 }
  0xb1   : > { %945 = vst [vmem:[#allocation2 + $0x4] sm:$0x4] %v944_v63  ;;  %v950_v22 = vsel %vm2581_vm11, 0, %v949_v19  ;;  %v953_v33 = vsel %vm2581_vm11, 0, %v952_v32  ;;  %vm1002_vm12 = vsmask.f32 2306 }
  0xb2   : > { %948 = vst [vmem:[#allocation2 + $0x8] sm:$0x4] %v947_v1  ;;  %v1016_v10 = vld [vmem:[#allocation2] sm:$0x3] }
  0xb3   : > { %942 = vst [vmem:[#allocation2] sm:$0x4] %v941_v6 }
  0xb4   : > { %957 = vst [vmem:[#allocation2 + $0x14] sm:$0x4] %v956_v9 }
  0xb5   : > { %v643_v45 = vpop.permute.xlu2 %642  ;;  %1021 = vst [vmem:[#allocation1] ss:$2 sm:$0xff] %v1016_v10 }
  0xb6   : > { %951 = vst [vmem:[#allocation2 + $0xc] sm:$0x4] %v950_v22 }
  0xb7   : > { %954 = vst [vmem:[#allocation2 + $0x10] sm:$0x4] %v953_v33 }
  0xb8   : > { %v500_v42 = vpop.permute.xlu0 %499  ;;  %v1004_v41 = vld [vmem:[#allocation2 + $0x4] sm:$0x7] }
  0xb9   : > { %506 = vst.msk [vmem:[#allocation4] sm:$0xf] %vm505_vm13, %v500_v42 }
  0xba   : > { %618 = vst.msk [vmem:[#allocation4] sm:$0xf] %vm617_vm14, %v612_v39  ;;  %v1038_v20 = vld [vmem:[#allocation2] sm:$0x7] }
  0xbb   : > { %v502_v44 = vpop.permute.xlu1 %501  ;;  %v1046_v29 = vrot.slane %v1038_v20, 2 }
  0xbc   : > { %507 = vst.msk [vmem:[#allocation4 + $0x8] sm:$0xf] %vm505_vm13, %v502_v44  ;;  %vm2617_vm13 = vmand %vm912_vm9, %vm1002_vm12  ;;  %vm1262_vm9 = vcmask 1044224  }
  0xbd   : > { %v1052_v39 = vsel %vm341_vm0, %v1038_v20, %v1046_v29 }
  0xc4   : > { %v614_v46 = vpop.permute.xlu0 %613 }
  0xc5   : > { %619 = vst.msk [vmem:[#allocation4 + $0x8] sm:$0xf] %vm617_vm14, %v614_v46  ;;  %v1007_v46 = vld [vmem:[#allocation2 + $0x8] sm:$0x7]  ;;  %vm1190_vm14 = vcmask 1040384  }
  0xc6   : > { %648 = vst.msk [vmem:[#allocation4 + $0x8] sm:$0xf] %vm646_vm2, %v643_v45 }
  0xca   : > { %v641_v47 = vpop.permute.xlu1 %640 }
  0xcb   : > { %647 = vst.msk [vmem:[#allocation4] sm:$0xf] %vm646_vm2, %v641_v47  ;;  %v1053_v47 = vsel %vm345_vm1, %v1038_v20, %v1046_v29  ;;  %vm1192_vm2 = vmor %vm1190_vm14, %vm1191_vm15 }
  0xcc   : > { %v1055_v57 = vrot.slane %v1053_v47, 2 }
  0xce   : > { %v1083_v61 = vshll.u32 %v1055_v57, 16 }
  0xd0   : > { %v1085_v5 = vrot.slane %v1083_v61, 7 }
  0xd3   : > { %v670_v49 = vpop.permute.xlu0 %669 }
  0xd4   : > { %676 = vst.msk [vmem:[#allocation4] sm:$0xf] %vm675_vm3, %v670_v49  ;;  %v1074_v49 = vshrl.u32 %v1052_v39, 16 }
  0xd6   : > { %v672_v51 = vpop.permute.xlu1 %671  ;;  %v1076_v58 = vrot.slane %v1074_v49, 6 }
  0xd7   : > { %677 = vst.msk [vmem:[#allocation4 + $0x8] sm:$0xf] %vm675_vm3, %v672_v51  ;;  %v1077_v51 = vshll.u32 %v1052_v39, 16  ;;  %vm1193_vm3 = vcmask 1044484  }
  0xd8   : > { %vm1194_vm5 = vmor %vm1192_vm2, %vm1193_vm3 }
  0xd9   : > { %v1079_v59 = vrot.slane %v1077_v51, 7  ;;  %vm2645_vm6 = vmor %vm1194_vm5, %vm1195_vm4 }
  0xdb   : > { %v2012_v52 = vld [vmem:[#allocation4] sm:$0xf]  ;;  %v1080_v62 = vor.u32 %v1079_v59, %v1076_v58 }
  0xdd   : > { %v1081_v10 = vrot.slane %v1080_v62, 2 }
  0xde   : > { %v2170_v53 = vld [vmem:[#allocation4 + $0x4] sm:$0xf0] }
  0xdf   : > { %v2013_v54 = vor.u32 %v2170_v53, %v2012_v52  ;;  %v1086_v21 = vsel %vm2463_vm8, %v1081_v10, %v1085_v5 }
  0xe1   : > { %878 = vmatmul.bf16.vlgmr.msra.gmra.mxu0 %v2013_v54 }
  0xf4   : > { %v893_v11 = vpop.f32.mrf.mxu1 }
  0xfc   : > { %v895_v25 = vpop.f32.mrf.mxu1 }
 0x15e   : > { %v879_v13 = vpop.f32.mrf.mxu0 }
 0x15f   : > { %v894_v14 = vadd.f32 %v893_v11, %v879_v13 }
 0x161   : > { %v902_v16 = vmul.f32 %v2251_v12, %v894_v14 }
 0x163   : > { %v2604_v17 = vadd.f32 %v2252_v15, %v902_v16 }
 0x165   : > { %v910_v23 = vmax.f32 %v2604_v17, 0.0 }
 0x166   : > { %v881_v26 = vpop.f32.mrf.mxu0 }
 0x167   : > { %v960_v28 = vrot.slane %v910_v23, 4  ;;  %v964_v31 = vpack.c.bf16 %v910_v23, %v910_v23  ;;  %v896_v30 = vadd.f32 %v895_v25, %v881_v26 }
 0x169   : > { %v965_v34 = vpack.c.bf16 %v960_v28, %v960_v28  ;;  %v969_v35 = vshrl.u32 %v964_v31, 16  ;;  %v903_v48 = vmul.f32 %v2251_v12, %v896_v30  ;;  %v972_v37 = vshll.u32 %v964_v31, 16  ;;  %v1150_v31 = vld [vmem:[#allocation2] sm:$0x6] }
 0x16b   : > { %v971_v36 = vrot.slane %v969_v35, 7  ;;  %v976_v38 = vshrl.u32 %v965_v34, 16  ;;  %v2621_v42 = vadd.f32 %v2252_v15, %v903_v48  ;;  %v979_v45 = vshll.u32 %v965_v34, 16  ;;  %v1010_v15 = vld [vmem:[#allocation2 + $0xc] sm:$0x7] }
 0x16c   : > { %v1158_v48 = vrot.slane %v1150_v31, 2 }
 0x16d   : > { %v974_v43 = vor.u32 %v972_v37, %v971_v36  ;;  %v978_v44 = vrot.slane %v976_v38, 7  ;;  %v911_v52 = vmax.f32 %v2621_v42, 0.0 }
 0x16f   : > { %v981_v53 = vor.u32 %v979_v45, %v978_v44  ;;  %v1005_v54 = vsel %vm2617_vm13, %v974_v43, %v1004_v41  ;;  %v966_v55 = vpack.c.bf16 %v911_v52, %v911_v52  ;;  %v961_v30 = vrot.slane %v911_v52, 4 }
 0x170   : > { %1006 = vst [vmem:[#allocation2 + $0x4] sm:$0x7] %v1005_v54  ;;  %v1164_v41 = vsel %vm341_vm0, %v1150_v31, %v1158_v48  ;;  %v1166_v43 = vsel %vm345_vm1, %v1150_v31, %v1158_v48 }
 0x171   : > { %v1008_v56 = vsel %vm2617_vm13, %v981_v53, %v1007_v46  ;;  %v983_v60 = vshrl.u32 %v966_v55, 16  ;;  %v986_v6 = vshll.u32 %v966_v55, 16  ;;  %v967_v37 = vpack.c.bf16 %v961_v30, %v961_v30 }
 0x172   : > { %1009 = vst [vmem:[#allocation2 + $0x8] sm:$0x7] %v1008_v56  ;;  %v2055_v51 = vrot.slane %v1164_v41, 9  ;;  %v2056_v52 = vrot.slane %v1166_v43, 9 }
 0x173   : > { %v985_v1 = vrot.slane %v983_v60, 7  ;;  %v990_v46 = vshrl.u32 %v967_v37, 16 }
 0x174   : > { %v1200_v60 = vsel %vm2645_vm6, %v2055_v51, %v2056_v52 }
 0x175   : > { %v988_v14 = vor.u32 %v986_v6, %v985_v1  ;;  %v992_v59 = vrot.slane %v990_v46, 7 }
 0x177   : > { %v1017_v63 = vld [vmem:[#allocation2 + $0x4] sm:$0x3]  ;;  %v1011_v23 = vsel %vm2617_vm13, %v988_v14, %v1010_v15 }
 0x178   : > { %v1039_v0 = vld [vmem:[#allocation2 + $0x4] sm:$0x7]  ;;  %1024 = vst [vmem:[#allocation1 + $0x1] ss:$2 sm:$0xff] %v1017_v63  ;;  %v993_v63 = vshll.u32 %v967_v37, 16 }
 0x179   : > { %v1047_v2 = vrot.slane %v1039_v0, 2  ;;  %v1018_v3 = vld [vmem:[#allocation2 + $0x8] sm:$0x3]  ;;  %1012 = vst [vmem:[#allocation2 + $0xc] sm:$0x7] %v1011_v23 }
 0x17a   : > { %v1040_v4 = vld [vmem:[#allocation2 + $0x8] sm:$0x7]  ;;  %1027 = vst [vmem:[#allocation1 + $0x10] ss:$2 sm:$0xff] %v1018_v3  ;;  %v1151_v35 = vld [vmem:[#allocation2 + $0x4] sm:$0x6] }
 0x17b   : > { %v1048_v7 = vrot.slane %v1040_v4, 2  ;;  %v1058_v8 = vsel %vm341_vm0, %v1039_v0, %v1047_v2  ;;  %v1059_v9 = vsel %vm345_vm1, %v1039_v0, %v1047_v2  ;;  %v1159_v38 = vrot.slane %v1151_v35, 2  ;;  %v1265_v61 = vld [vmem:[#allocation2 + $0x4] sm:$0x7]  ;;  %v1266_v62 = vld [vmem:[#allocation2 + $0x8] sm:$0x7] }
 0x17c   : > { %v1061_v11 = vrot.slane %v1059_v9, 2  ;;  %v1087_v12 = vshrl.u32 %v1058_v8, 16  ;;  %v1090_v13 = vshll.u32 %v1058_v8, 16  ;;  %v1273_v6 = vrot.slane %v1265_v61, 2 }
 0x17d   : > { %v1064_v20 = vsel %vm341_vm0, %v1040_v4, %v1048_v7  ;;  %v1065_v32 = vsel %vm345_vm1, %v1040_v4, %v1048_v7  ;;  %v1171_v47 = vsel %vm341_vm0, %v1151_v35, %v1159_v38  ;;  %v1173_v49 = vsel %vm345_vm1, %v1151_v35, %v1159_v38  ;;  %v1013_v4 = vld [vmem:[#allocation2 + $0x10] sm:$0x7]  ;;  %v1238_v35 = vld [vmem:[#allocation2 + $0x8] sm:$0x3] }
 0x17e   : > { %v1089_v16 = vrot.slane %v1087_v12, 6  ;;  %v1092_v18 = vrot.slane %v1090_v13, 7  ;;  %v1096_v19 = vshll.u32 %v1061_v11, 16  ;;  %v1100_v27 = vshrl.u32 %v1064_v20, 16 }
 0x17f   : > { %v2636_v24 = vld.sshfl [vmem:[#allocation1] sm:$0xff pattern:$0x75643120]  ;;  %v1103_v28 = vshll.u32 %v1064_v20, 16  ;;  %v1067_v36 = vrot.slane %v1065_v32, 2  ;;  %v2057_v57 = vrot.slane %v1171_v47, 9  ;;  %v995_v7 = vor.u32 %v993_v63, %v992_v59 }
 0x180   : > { %v1093_v22 = vor.u32 %v1092_v18, %v1089_v16  ;;  %v1098_v26 = vrot.slane %v1096_v19, 7  ;;  %1127 = vst [vmem:[#allocation1] ss:$2 sm:$0xff] %v1086_v21  ;;  %v1102_v33 = vrot.slane %v1100_v27, 6  ;;  %v1019_v44 = vld [vmem:[#allocation2 + $0xc] sm:$0x3]  ;;  %v1279_v15 = vsel %vm341_vm0, %v1265_v61, %v1273_v6 }
 0x181   : > { %v1105_v34 = vrot.slane %v1103_v28, 7  ;;  %1030 = vst [vmem:[#allocation1 + $0x11] ss:$2 sm:$0xff] %v1019_v44  ;;  %v1109_v45 = vshll.u32 %v1067_v36, 16  ;;  %v1041_v54 = vld [vmem:[#allocation2 + $0xc] sm:$0x7]  ;;  %v1014_v11 = vsel %vm2617_vm13, %v995_v7, %v1013_v4  ;;  %v1280_v32 = vsel %vm345_vm1, %v1265_v61, %v1273_v6 }
 0x182   : > { %v1094_v25 = vrot.slane %v1093_v22, 2  ;;  %v2058_v58 = vrot.slane %v1173_v49, 9  ;;  %v1049_v0 = vrot.slane %v1041_v54, 2  ;;  %v1274_v8 = vrot.slane %v1266_v62, 2  ;;  %1015 = vst [vmem:[#allocation2 + $0x10] sm:$0x7] %v1014_v11 }
 0x183   : > { %v1106_v39 = vor.u32 %v1105_v34, %v1102_v33  ;;  %v1111_v55 = vrot.slane %v1109_v45, 7  ;;  %v1152_v21 = vld [vmem:[#allocation2 + $0x8] sm:$0x6]  ;;  %v1237_v22 = vld [vmem:[#allocation2 + $0x4] sm:$0x3]  ;;  %v1301_v23 = vshrl.u32 %v1279_v15, 16 }
 0x184   : > { %v1099_v29 = vsel %vm2463_vm8, %v1094_v25, %v1098_v26  ;;  %v1204_v5 = vsel %vm2645_vm6, %v2057_v57, %v2058_v58  ;;  %v1070_v9 = vsel %vm341_vm0, %v1041_v54, %v1049_v0  ;;  %v1071_v10 = vsel %vm345_vm1, %v1041_v54, %v1049_v0  ;;  %v1153_v30 = vld [vmem:[#allocation2 + $0xc] sm:$0x6]  ;;  %v1370_v57 = vld [vmem:[#allocation2 + $0x4] sm:$0x6]  ;;  %1036 = vst.msk [vmem:[#allocation3] sm:$0xf] %vm1035_vm7, %v2636_v24 }
 0x185   : > { %1130 = vst [vmem:[#allocation1 + $0x1] ss:$2 sm:$0xff] %v1099_v29  ;;  %v1107_v53 = vrot.slane %v1106_v39, 2  ;;  %v1073_v12 = vrot.slane %v1071_v10, 2  ;;  %v1113_v13 = vshrl.u32 %v1070_v9, 16  ;;  %v1116_v14 = vshll.u32 %v1070_v9, 16 }
 0x186   : > { %v1285_v16 = vsel %vm341_vm0, %v1266_v62, %v1274_v8  ;;  %v1304_v26 = vshll.u32 %v1279_v15, 16  ;;  %v1160_v33 = vrot.slane %v1152_v21, 2  ;;  %v1286_v48 = vsel %vm345_vm1, %v1266_v62, %v1274_v8  ;;  %v1267_v44 = vld [vmem:[#allocation2 + $0xc] sm:$0x7] }
 0x187   : > { %v1112_v1 = vsel %vm2463_vm8, %v1107_v53, %v1111_v55  ;;  %v1115_v18 = vrot.slane %v1113_v13, 6  ;;  %v1118_v19 = vrot.slane %v1116_v14, 7  ;;  %v1122_v20 = vshll.u32 %v1073_v12, 16 }
 0x188   : > { %v2653_v2 = vld.sshfl [vmem:[#allocation1 + $0x10] sm:$0xff pattern:$0x75643120]  ;;  %v1314_v27 = vshrl.u32 %v1285_v16, 16  ;;  %v1317_v28 = vshll.u32 %v1285_v16, 16  ;;  %v1303_v36 = vrot.slane %v1301_v23, 6  ;;  %v1178_v45 = vsel %vm341_vm0, %v1152_v21, %v1160_v33 }
 0x189   : > { %1133 = vst [vmem:[#allocation1 + $0x10] ss:$2 sm:$0xff] %v1112_v1  ;;  %v1119_v25 = vor.u32 %v1118_v19, %v1115_v18  ;;  %v1124_v29 = vrot.slane %v1122_v20, 7  ;;  %v1306_v37 = vrot.slane %v1304_v26, 7  ;;  %v1161_v38 = vrot.slane %v1153_v30, 2 }
 0x18a   : > { %v1282_v39 = vrot.slane %v1280_v32, 2  ;;  %v1316_v41 = vrot.slane %v1314_v27, 6  ;;  %v1319_v43 = vrot.slane %v1317_v28, 7  ;;  %v1180_v46 = vsel %vm345_vm1, %v1152_v21, %v1160_v33  ;;  %v1268_v49 = vld [vmem:[#allocation2 + $0x10] sm:$0x7] }
 0x18b   : > { %v1120_v31 = vrot.slane %v1119_v25, 2  ;;  %v1288_v47 = vrot.slane %v1286_v48, 2  ;;  %v1307_v51 = vor.u32 %v1306_v37, %v1303_v36  ;;  %v1185_v52 = vsel %vm341_vm0, %v1153_v30, %v1161_v38  ;;  %v1477_v18 = vld [vmem:[#allocation2 + $0x8] sm:$0x7]  ;;  %v1478_v26 = vld [vmem:[#allocation2 + $0xc] sm:$0x7] }
 0x18c   : > { %v1137_v3 = vld.sshfl [vmem:[#allocation1] sm:$0xff pattern:$0x75643120]  ;;  %v1187_v53 = vsel %vm345_vm1, %v1153_v30, %v1161_v38  ;;  %v1310_v54 = vshll.u32 %v1282_v39, 16  ;;  %v1320_v55 = vor.u32 %v1319_v43, %v1316_v41  ;;  %v1275_v58 = vrot.slane %v1267_v44, 2 }
 0x18d   : > { %1141 = vrot.lane.b32.xlu2 %v1137_v3, %s2320_s19  ;;  %1214 = vst [vmem:[#allocation1] ss:$2 sm:$0xff] %v1200_v60  ;;  %v1125_v34 = vsel %vm2463_vm8, %v1120_v31, %v1124_v29  ;;  %v2059_v59 = vrot.slane %v1178_v45, 9  ;;  %v2060_v60 = vrot.slane %v1180_v46, 9  ;;  %v1276_v61 = vrot.slane %v1268_v49, 2 }
 0x18e   : > { %1217 = vst [vmem:[#allocation1 + $0x1] ss:$2 sm:$0xff] %v1204_v5  ;;  %v1323_v62 = vshll.u32 %v1288_v47, 16  ;;  %v2061_v63 = vrot.slane %v1185_v52, 9  ;;  %v2062_v0 = vrot.slane %v1187_v53, 9  ;;  %v1308_v1 = vrot.slane %v1307_v51, 2 }
 0x18f   : > { %1136 = vst [vmem:[#allocation1 + $0x11] ss:$2 sm:$0xff] %v1125_v34  ;;  %v1371_v3 = vld [vmem:[#allocation2 + $0x8] sm:$0x6]  ;;  %v1378_v4 = vrot.slane %v1370_v57, 2  ;;  %v1312_v5 = vrot.slane %v1310_v54, 7  ;;  %v1291_v7 = vsel %vm341_vm0, %v1267_v44, %v1275_v58  ;;  %v1208_v8 = vsel %vm2645_vm6, %v2059_v59, %v2060_v60 }
 0x190   : > { %v1321_v6 = vrot.slane %v1320_v55, 2  ;;  %v1297_v9 = vsel %vm341_vm0, %v1268_v49, %v1276_v61  ;;  %v1325_v12 = vrot.slane %v1323_v62, 7  ;;  %v1379_v13 = vrot.slane %v1371_v3, 2  ;;  %1037 = vst.msk [vmem:[#allocation3 + $0xc] sm:$0xf] %vm1035_vm7, %v2653_v2 }
 0x191   : > { %v1212_v14 = vsel %vm2645_vm6, %v2061_v63, %v2062_v0  ;;  %v1313_v15 = vsel %vm2463_vm8, %v1308_v1, %v1312_v5  ;;  %v1384_v16 = vsel %vm341_vm0, %v1370_v57, %v1378_v4  ;;  %v1327_v19 = vshrl.u32 %v1291_v7, 16  ;;  %v1240_v46 = vld [vmem:[#allocation2 + $0x10] sm:$0x3]  ;;  %v1480_v0 = vld [vmem:[#allocation2 + $0x14] sm:$0x7] }
 0x192   : > { %v1330_v20 = vshll.u32 %v1291_v7, 16  ;;  %v1326_v21 = vsel %vm2463_vm8, %v1321_v6, %v1325_v12  ;;  %v1343_v23 = vshll.u32 %v1297_v9, 16  ;;  %v1386_v25 = vsel %vm345_vm1, %v1370_v57, %v1378_v4  ;;  %v1373_v59 = vld [vmem:[#allocation2 + $0x10] sm:$0x6] }
 0x193   : > { %v1391_v27 = vsel %vm341_vm0, %v1371_v3, %v1379_v13  ;;  %v1393_v28 = vsel %vm345_vm1, %v1371_v3, %v1379_v13  ;;  %v1485_v31 = vrot.slane %v1477_v18, 2  ;;  %v1292_v29 = vsel %vm345_vm1, %v1267_v44, %v1275_v58  ;;  %v1239_v44 = vld [vmem:[#allocation2 + $0xc] sm:$0x3] }
 0x194   : > { %v2063_v30 = vrot.slane %v1384_v16, 9  ;;  %v1298_v32 = vsel %vm345_vm1, %v1268_v49, %v1276_v61  ;;  %v1329_v33 = vrot.slane %v1327_v19, 6  ;;  %v1332_v34 = vrot.slane %v1330_v20, 7  ;;  %v1450_v16 = vld [vmem:[#allocation2 + $0x8] sm:$0x3] }
 0x195   : > { %v2664_v40 = vld.sshfl [vmem:[#allocation1] sm:$0xff pattern:$0x75643120]  ;;  %v1345_v36 = vrot.slane %v1343_v23, 7  ;;  %v1486_v37 = vrot.slane %v1478_v26, 2  ;;  %v2065_v38 = vrot.slane %v1391_v27, 9  ;;  %v1491_v43 = vsel %vm341_vm0, %v1477_v18, %v1485_v31 }
 0x196   : > { %1242 = vst [vmem:[#allocation1] ss:$2 sm:$0xff] %v1237_v22  ;;  %v1139_v10 = vld.sshfl [vmem:[#allocation1 + $0x10] sm:$0xff pattern:$0x75643120]  ;;  %v1340_v22 = vshrl.u32 %v1297_v9, 16  ;;  %v1333_v47 = vor.u32 %v1332_v34, %v1329_v33  ;;  %v1492_v1 = vsel %vm345_vm1, %v1477_v18, %v1485_v31 }
 0x197   : > { %1245 = vst [vmem:[#allocation1 + $0x1] ss:$2 sm:$0xff] %v1238_v35  ;;  %1143 = vrot.lane.b32.xlu0 %v1139_v10, %s2320_s19  ;;  %v2064_v35 = vrot.slane %v1386_v25, 9  ;;  %v2066_v39 = vrot.slane %v1393_v28, 9  ;;  %v1294_v41 = vrot.slane %v1292_v29, 2  ;;  %v1300_v45 = vrot.slane %v1298_v32, 2 }
 0x198   : > { %1220 = vst [vmem:[#allocation1 + $0x10] ss:$2 sm:$0xff] %v1208_v8  ;;  %v1342_v48 = vrot.slane %v1340_v22, 6  ;;  %v1497_v51 = vsel %vm341_vm0, %v1478_v26, %v1486_v37  ;;  %v1513_v54 = vshrl.u32 %v1491_v43, 16  ;;  %v1516_v57 = vshll.u32 %v1491_v43, 16 }
 0x199   : > { %1223 = vst [vmem:[#allocation1 + $0x11] ss:$2 sm:$0xff] %v1212_v14  ;;  %v1413_v2 = vsel %vm2645_vm6, %v2063_v30, %v2064_v35  ;;  %v1417_v53 = vsel %vm2645_vm6, %v2065_v38, %v2066_v39  ;;  %v1336_v55 = vshll.u32 %v1294_v41, 16  ;;  %v1349_v58 = vshll.u32 %v1300_v45, 16  ;;  %v2708_v9 = vld [vmem:[#allocation2 + $0x10] sm:$0x7] }
 0x19a   : > { %v1346_v49 = vor.u32 %v1345_v36, %v1342_v48  ;;  %v1334_v60 = vrot.slane %v1333_v47, 2  ;;  %v1526_v61 = vshrl.u32 %v1497_v51, 16  ;;  %v1529_v62 = vshll.u32 %v1497_v51, 16  ;;  %v1588_v35 = vld [vmem:[#allocation2 + $0x8] sm:$0x6] }
 0x19b   : > { %v1515_v3 = vrot.slane %v1513_v54, 6  ;;  %v1338_v4 = vrot.slane %v1336_v55, 7  ;;  %v1518_v6 = vrot.slane %v1516_v57, 7  ;;  %v1351_v7 = vrot.slane %v1349_v58, 7  ;;  %v1589_v41 = vld [vmem:[#allocation2 + $0xc] sm:$0x6] }
 0x19c   : > { %v1347_v63 = vrot.slane %v1346_v49, 2  ;;  %v1381_v8 = vrot.slane %v1373_v59, 2  ;;  %v1498_v10 = vsel %vm345_vm1, %v1478_v26, %v1486_v37  ;;  %v1528_v13 = vrot.slane %v1526_v61, 6 }
 0x19d   : > { %v1339_v12 = vsel %vm2463_vm8, %v1334_v60, %v1338_v4  ;;  %v1531_v14 = vrot.slane %v1529_v62, 7  ;;  %v1488_v18 = vrot.slane %v1480_v0, 2  ;;  %v1494_v19 = vrot.slane %v1492_v1, 2 }
 0x19e   : > { %v2678_v11 = vld.sshfl [vmem:[#allocation1] sm:$0xff pattern:$0x75643120]  ;;  %v1352_v20 = vsel %vm2463_vm8, %v1347_v63, %v1351_v7  ;;  %v1500_v23 = vrot.slane %v1498_v10, 2  ;;  %v1519_v26 = vor.u32 %v1518_v6, %v1515_v3  ;;  %v1405_v27 = vsel %vm341_vm0, %v1373_v59, %v1381_v8 }
 0x19f   : > { %1354 = vst [vmem:[#allocation1] ss:$2 sm:$0xff] %v1313_v15  ;;  %1228 = vrot.lane.b32.xlu0 %v2664_v40, %s2322_s21  ;;  %v1372_v40 = vld [vmem:[#allocation2 + $0xc] sm:$0x6]  ;;  %v1407_v28 = vsel %vm345_vm1, %v1373_v59, %v1381_v8  ;;  %v1487_v31 = vrot.slane %v2708_v9, 2  ;;  %v1532_v29 = vor.u32 %v1531_v14, %v1528_v13  ;;  %v1509_v30 = vsel %vm341_vm0, %v1480_v0, %v1488_v18  ;;  %v2200_v59 = vld [vmem:[%s2885_s4 + $0x88] sm:$0xff] }
 0x1a0   : > { %1357 = vst [vmem:[#allocation1 + $0x1] ss:$2 sm:$0xff] %v1326_v21  ;;  %v1226_v24 = vld.sshfl [vmem:[#allocation1 + $0x10] sm:$0xff pattern:$0x75643120]  ;;  %v1380_v5 = vrot.slane %v1372_v40, 2  ;;  %v1510_v43 = vsel %vm345_vm1, %v1480_v0, %v1488_v18  ;;  %1862 = vmatpush.bf16.msrb.mxu1 %v2200_v59 }
 0x1a1   : > { %1230 = vrot.lane.b32.xlu1 %v1226_v24, %s2322_s21  ;;  %1248 = vst [vmem:[#allocation1 + $0x10] ss:$2 sm:$0xff] %v1239_v44  ;;  %v1522_v32 = vshll.u32 %v1494_v19, 16  ;;  %v2069_v48 = vrot.slane %v1405_v27, 9  ;;  %v2070_v36 = vrot.slane %v1407_v28, 9  ;;  %v1535_v37 = vshll.u32 %v1500_v23, 16 }
 0x1a2   : > { %1251 = vst [vmem:[#allocation1 + $0x11] ss:$2 sm:$0xff] %v1240_v46  ;;  %v1398_v21 = vsel %vm341_vm0, %v1372_v40, %v1380_v5  ;;  %v1400_v22 = vsel %vm345_vm1, %v1372_v40, %v1380_v5  ;;  %v1520_v38 = vrot.slane %v1519_v26, 2  ;;  %v1503_v39 = vsel %vm341_vm0, %v2708_v9, %v1487_v31  ;;  %v2199_v5 = vld [vmem:[%s2885_s4 + $0x80] sm:$0xff]  ;;  %v1452_v19 = vld [vmem:[#allocation2 + $0x10] sm:$0x3] }
 0x1a3   : > { %v2067_v33 = vrot.slane %v1398_v21, 9  ;;  %v2068_v34 = vrot.slane %v1400_v22, 9  ;;  %v1552_v44 = vshrl.u32 %v1509_v30, 16  ;;  %v1533_v45 = vrot.slane %v1532_v29, 2  ;;  %v2197_v59 = vld [vmem:[%s2885_s4 + $0x70] sm:$0xff] }
 0x1a4   : > { %v1524_v24 = vrot.slane %v1522_v32, 7  ;;  %v1555_v46 = vshll.u32 %v1509_v30, 16  ;;  %v1596_v47 = vrot.slane %v1588_v35, 2  ;;  %v1425_v51 = vsel %vm2645_vm6, %v2069_v48, %v2070_v36  ;;  %1863 = vmatpush.bf16.msrb.mxu1 %v2199_v5  ;;  %v2193_v5 = vld [vmem:[%s2885_s4 + $0x50] sm:$0xff] }
 0x1a5   : > { %v1597_v54 = vrot.slane %v1589_v41, 2  ;;  %v1542_v40 = vshll.u32 %v1503_v39, 16  ;;  %v1512_v60 = vrot.slane %v1510_v43, 2  ;;  %v1554_v61 = vrot.slane %v1552_v44, 6 }
 0x1a6   : > { %v1525_v55 = vsel %vm2463_vm8, %v1520_v38, %v1524_v24  ;;  %v1602_v62 = vsel %vm341_vm0, %v1588_v35, %v1596_v47  ;;  %v1604_v63 = vsel %vm345_vm1, %v1588_v35, %v1596_v47  ;;  %v1557_v0 = vrot.slane %v1555_v46, 7 }
 0x1a7   : > { %v1364_v52 = vld.sshfl [vmem:[#allocation1] sm:$0xff pattern:$0x75643120]  ;;  %v1504_v1 = vsel %vm345_vm1, %v2708_v9, %v1487_v31  ;;  %v1609_v3 = vsel %vm341_vm0, %v1589_v41, %v1597_v54  ;;  %v1611_v4 = vsel %vm345_vm1, %v1589_v41, %v1597_v54  ;;  %v1544_v7 = vrot.slane %v1542_v40, 7  ;;  %v1590_v31 = vld [vmem:[#allocation2 + $0x10] sm:$0x6] }
 0x1a8   : > { %1427 = vst [vmem:[#allocation1] ss:$2 sm:$0xff] %v1413_v2  ;;  %v1421_v2 = vsel %vm2645_vm6, %v2067_v33, %v2068_v34  ;;  %v2071_v8 = vrot.slane %v1602_v62, 9  ;;  %v2072_v10 = vrot.slane %v1604_v63, 9  ;;  %v1506_v13 = vrot.slane %v1504_v1, 2  ;;  %v2186_v54 = vld [vmem:[%s2885_s4 + $0x18] sm:$0xff] }
 0x1a9   : > { %1430 = vst [vmem:[#allocation1 + $0x1] ss:$2 sm:$0xff] %v1417_v53  ;;  %v2713_v15 = vld.sshfl [vmem:[#allocation1 + $0x10] sm:$0xff pattern:$0x75643120]  ;;  %1256 = vrot.lane.b32.xlu1 %v2678_v11, %s2324_s23  ;;  %v1539_v53 = vshrl.u32 %v1503_v39, 16  ;;  %v1558_v9 = vor.u32 %v1557_v0, %v1554_v61 }
 0x1aa   : > { %1368 = vst.msk [vmem:[#allocation3 + $0x4] sm:$0xf] %vm1035_vm7, %v1364_v52  ;;  %v1451_v11 = vld [vmem:[#allocation2 + $0xc] sm:$0x3]  ;;  %v1537_v52 = vrot.slane %v1535_v37, 7  ;;  %v2073_v14 = vrot.slane %v1609_v3, 9  ;;  %v1631_v22 = vsel %vm2645_vm6, %v2071_v8, %v2072_v10 }
 0x1ab   : > { %1360 = vst [vmem:[#allocation1 + $0x10] ss:$2 sm:$0xff] %v1339_v12  ;;  %v1541_v6 = vrot.slane %v1539_v53, 6  ;;  %v1453_v12 = vld [vmem:[#allocation2 + $0x14] sm:$0x3]  ;;  %v1561_v18 = vshll.u32 %v1512_v60, 16 }
 0x1ac   : > { %1363 = vst [vmem:[#allocation1 + $0x11] ss:$2 sm:$0xff] %v1352_v20  ;;  %v1538_v58 = vsel %vm2463_vm8, %v1533_v45, %v1537_v52  ;;  %v1548_v26 = vshll.u32 %v1506_v13, 16  ;;  %v1559_v28 = vrot.slane %v1558_v9, 2  ;;  %v1598_v33 = vrot.slane %v1590_v31, 2  ;;  %v2190_v52 = vld [vmem:[%s2885_s4 + $0x38] sm:$0xff] }
 0x1ad   : > { %v1545_v21 = vor.u32 %v1544_v7, %v1541_v6  ;;  %1828 = vmatpush.bf16.msra.mxu2 %v2190_v52  ;;  %v2187_v53 = vld [vmem:[%s2885_s4 + $0x20] sm:$0xff]  ;;  %v2184_v40 = vld [vmem:[%s2885_s4 + $0x8] sm:$0xff]  ;;  %v2194_v3 = vld [vmem:[%s2885_s4 + $0x58] sm:$0xff] }
 0x1ae   : > { %v1550_v32 = vrot.slane %v1548_v26, 7  ;;  %v1616_v38 = vsel %vm341_vm0, %v1590_v31, %v1598_v33  ;;  %v1618_v39 = vsel %vm345_vm1, %v1590_v31, %v1598_v33  ;;  %v2196_v61 = vld [vmem:[%s2885_s4 + $0x68] sm:$0xff]  ;;  %v2195_v0 = vld [vmem:[%s2885_s4 + $0x60] sm:$0xff] }
 0x1af   : > { %v1546_v29 = vrot.slane %v1545_v21, 2  ;;  %v2075_v44 = vrot.slane %v1616_v38, 9  ;;  %v2076_v45 = vrot.slane %v1618_v39, 9  ;;  %v2192_v7 = vld [vmem:[%s2885_s4 + $0x48] sm:$0xff]  ;;  %v2191_v10 = vld [vmem:[%s2885_s4 + $0x40] sm:$0xff] }
 0x1b0   : > { %v1437_v25 = vld.sshfl [vmem:[#allocation1] sm:$0xff pattern:$0x75643120] }
 0x1b1   : > { %1455 = vst [vmem:[#allocation1] ss:$2 sm:$0xff] %v1450_v16  ;;  %1441 = vrot.lane.b32.xlu1 %v1437_v25, %s2320_s19  ;;  %v2074_v16 = vrot.slane %v1611_v4, 9  ;;  %v1591_v25 = vld [vmem:[#allocation2 + $0x14] sm:$0x6]  ;;  %v1551_v35 = vsel %vm2463_vm8, %v1546_v29, %v1550_v32  ;;  %v1639_v46 = vsel %vm2645_vm6, %v2075_v44, %v2076_v45 }
 0x1b2   : > { %1458 = vst [vmem:[#allocation1 + $0x1] ss:$2 sm:$0xff] %v1451_v11  ;;  %v1563_v11 = vrot.slane %v1561_v18, 7  ;;  %v1599_v30 = vrot.slane %v1591_v25, 2  ;;  %v2254_v31 = vld [vmem:[%s2887_s6] ss:$0 sm:$0xff] }
 0x1b3   : > { %v1365_v49 = vld.sshfl [vmem:[#allocation1 + $0x10] sm:$0xff pattern:$0x75643120]  ;;  %v1635_v27 = vsel %vm2645_vm6, %v2073_v14, %v2074_v16 }
 0x1b4   : > { %1433 = vst [vmem:[#allocation1 + $0x10] ss:$2 sm:$0xff] %v1421_v2  ;;  %v1564_v34 = vsel %vm2463_vm8, %v1559_v28, %v1563_v11  ;;  %v1623_v36 = vsel %vm341_vm0, %v1591_v25, %v1599_v30  ;;  %v1625_v37 = vsel %vm345_vm1, %v1591_v25, %v1599_v30  ;;  %vm1147_vm0 = vcmask 519424   ;;  %v2253_v28 = vld [vmem:[%s2886_s5] ss:$0 sm:$0xff] }
 0x1b5   : > { %1436 = vst [vmem:[#allocation1 + $0x11] ss:$2 sm:$0xff] %v1425_v51  ;;  %v2077_v50 = vrot.slane %v1623_v36, 9  ;;  %v2078_v43 = vrot.slane %v1625_v37, 9  ;;  %vm1824_vm1 = vcmask 261120   ;;  %vm1234_vm8 = vcmask 781824  }
 0x1b6   : > { %1369 = vst.msk [vmem:[#allocation3 + $0x10] sm:$0xf] %vm1035_vm7, %v1365_v49 }
 0x1b7   : > { %v1643_v24 = vsel %vm2645_vm6, %v2077_v50, %v2078_v43 }
 0x1b9   : > { %v1465_v57 = vld.sshfl [vmem:[#allocation1] sm:$0xff pattern:$0x75643120] }
 0x1ba   : > { %1566 = vst [vmem:[#allocation1] ss:$2 sm:$0xff] %v1525_v55  ;;  %v2185_v55 = vld [vmem:[%s2885_s4 + $0x10] sm:$0xff] }
 0x1bb   : > { %1569 = vst [vmem:[#allocation1 + $0x1] ss:$2 sm:$0xff] %v1538_v58  ;;  %v2183_v58 = vld [vmem:[%s2885_s4] sm:$0xff] }
 0x1bc   : > { %v1439_v20 = vld.sshfl [vmem:[#allocation1 + $0x10] sm:$0xff pattern:$0x75643120] }
 0x1bd   : > { %1443 = vrot.lane.b32.xlu2 %v1439_v20, %s2320_s19  ;;  %1461 = vst [vmem:[#allocation1 + $0x10] ss:$2 sm:$0xff] %v1452_v19  ;;  %s271_s19 = scalar_lea.vmem [#allocation5], %s1980_s13  ;;  %s2275_s13 = scalar_lea.hbm %s2888_s7, 16 }
 0x1be   : > { %1464 = vst [vmem:[#allocation1 + $0x11] ss:$2 sm:$0xff] %v1453_v12  ;;  %p2277_p1 = scmp.lt.s32.totalorder %s2275_s13, %s2271_s22 }
 0x1c0   : > { %p2278_p2 = por %p2277_p1, %p2276_p0 }
 0x1c2   : > { %v1576_v23 = vld.sshfl [vmem:[#allocation1] sm:$0xff pattern:$0x75643120]  ;;  %p2279_p3 = pnand %p2278_p2, %p2274_p13 }
 0x1c3   : > { %1645 = vst [vmem:[#allocation1] ss:$2 sm:$0xff] %v1631_v22 }
 0x1c4   : > { %1648 = vst [vmem:[#allocation1 + $0x1] ss:$2 sm:$0xff] %v1635_v27 }
 0x1c5   : > { %1469 = vrot.lane.b32.xlu2 %v1465_v57, %s2322_s21  ;;  %v1467_v48 = vld.sshfl [vmem:[#allocation1 + $0x10] sm:$0xff pattern:$0x75643120]  ;;  %v2198_v57 = vld [vmem:[%s2885_s4 + $0x78] sm:$0xff] }
 0x1c6   : > { %1471 = vrot.lane.b32.xlu0 %v1467_v48, %s2322_s21  ;;  %1572 = vst [vmem:[#allocation1 + $0x10] ss:$2 sm:$0xff] %v1551_v35  ;;  %1842 = vmatpush.bf16.msra.mxu3 %v2198_v57 }
 0x1c7   : > { %1575 = vst [vmem:[#allocation1 + $0x11] ss:$2 sm:$0xff] %v1564_v34 }
 0x1ca   : > { %1843 = vmatpush.bf16.msra.mxu3 %v2197_v59 }
 0x1cb   : > { %v1655_v41 = vld.sshfl [vmem:[#allocation1] sm:$0xff pattern:$0x75643120] }
 0x1cc   : > { %1659 = vst.msk [vmem:[#allocation3 + $0x8] sm:$0xf] %vm1035_vm7, %v1655_v41 }
 0x1cd   : > { %1258 = vrot.lane.b32.xlu2 %v2713_v15, %s2324_s23 }
 0x1ce   : > { %1580 = vrot.lane.b32.xlu0 %v1576_v23, %s2324_s23  ;;  %v1578_v47 = vld.sshfl [vmem:[#allocation1 + $0x10] sm:$0xff pattern:$0x75643120]  ;;  %1844 = vmatpush.bf16.msra.mxu3 %v2196_v61 }
 0x1cf   : > { %1582 = vrot.lane.b32.xlu1 %v1578_v47, %s2324_s23  ;;  %1651 = vst [vmem:[#allocation1 + $0x10] ss:$2 sm:$0xff] %v1639_v46 }
 0x1d0   : > { %1654 = vst [vmem:[#allocation1 + $0x11] ss:$2 sm:$0xff] %v1643_v24 }
 0x1d2   : > { %1845 = vmatpush.bf16.msra.mxu3 %v2195_v0 }
 0x1d3   : > { %v2089_v56 = vld [vmem:[#allocation3 + $0x8] sm:$0xf] }
 0x1d5   : > { %1884 = vrot.lane.b32.xlu2 %v2604_v17, %s2324_s23  ;;  %v2189_v17 = vld [vmem:[%s2885_s4 + $0x30] sm:$0xff] }
 0x1d6   : > { %1886 = vrot.lane.b32.xlu0 %v2621_v42, %s2324_s23  ;;  %1829 = vmatpush.bf16.msra.mxu2 %v2189_v17  ;;  %v2188_v42 = vld [vmem:[%s2885_s4 + $0x28] sm:$0xff]  ;;  %s1911_s23 = sshll.u32 %s271_s19, 4  ;;  %s1912_s23 = int_to_ptr.vmem [resolvable:$true] %s1911_s23 }
 0x1d7   : > { %v1656_v2 = vld.sshfl [vmem:[#allocation1 + $0x10] sm:$0xff pattern:$0x75643120]  ;;  %1846 = vmatpush.bf16.msra.mxu3 %v2194_v3 }
 0x1d8   : > { %1660 = vst.msk [vmem:[#allocation3 + $0x14] sm:$0xf] %vm1035_vm7, %v1656_v2 }
 0x1da   : > { %1830 = vmatpush.bf16.msra.mxu2 %v2188_v42 }
 0x1db   : > { %1847 = vmatpush.bf16.msra.mxu3 %v2193_v5 }
 0x1de   : > { %1831 = vmatpush.bf16.msra.mxu2 %v2187_v53 }
 0x1df   : > { %v2182_v49 = vld [vmem:[#allocation3 + $0x10] sm:$0xf0]  ;;  %1848 = vmatpush.bf16.msra.mxu3 %v2192_v7 }
 0x1e0   : > { %v2090_v51 = vor.u32 %v2182_v49, %v2089_v56 }
 0x1e2   : > { %2163 = vmatmul.msk.bf16.vlgmr.msrb.gmra.mxu1 %vm1824_vm1, %v2090_v51  ;;  %1832 = vmatpush.bf16.msra.mxu2 %v2186_v54 }
 0x1e3   : > { %1849 = vmatpush.bf16.msra.mxu3 %v2191_v10 }
 0x1e6   : > { %1833 = vmatpush.bf16.msra.mxu2 %v2185_v55 }
 0x1e7   : > { %v1142_v15 = vpop.permute.xlu2 %1141 }
 0x1e8   : > { %1148 = vst.msk [vmem:[#allocation3] sm:$0xf] %vm1147_vm0, %v1142_v15 }
 0x1ea   : > { %1834 = vmatpush.bf16.msra.mxu2 %v2184_v40 }
 0x1ee   : > { %1835 = vmatpush.bf16.msra.mxu2 %v2183_v58 }
 0x209   : > { %v1144_v60 = vpop.permute.xlu0 %1143 }
 0x20a   : > { %1149 = vst.msk [vmem:[#allocation3 + $0xc] sm:$0xf] %vm1147_vm0, %v1144_v60 }
 0x211   : > { %v1229_v62 = vpop.permute.xlu0 %1228 }
 0x212   : > { %1235 = vst.msk [vmem:[#allocation3] sm:$0xf] %vm1234_vm8, %v1229_v62 }
 0x213   : > { %v1231_v63 = vpop.permute.xlu1 %1230 }
 0x214   : > { %1236 = vst.msk [vmem:[#allocation3 + $0xc] sm:$0xf] %vm1234_vm8, %v1231_v63 }
 0x217   : > { %v1444_v1 = vpop.permute.xlu2 %1443 }
 0x218   : > { %1448 = vst.msk [vmem:[#allocation3 + $0x10] sm:$0xf] %vm1147_vm0, %v1444_v1 }
 0x21b   : > { %v1257_v4 = vpop.permute.xlu1 %1256 }
 0x21c   : > { %1263 = vst.msk [vmem:[#allocation3] sm:$0xf] %vm1262_vm9, %v1257_v4 }
 0x21f   : > { %v1470_v6 = vpop.permute.xlu2 %1469 }
 0x223   : > { %v1442_v8 = vpop.permute.xlu1 %1441  ;;  %v2081_v13 = vld [vmem:[#allocation3] sm:$0xf] }
 0x224   : > { %1447 = vst.msk [vmem:[#allocation3 + $0x4] sm:$0xf] %vm1147_vm0, %v1442_v8 }
 0x225   : > { %1475 = vst.msk [vmem:[#allocation3 + $0x4] sm:$0xf] %vm1234_vm8, %v1470_v6 }
 0x227   : > { %v1259_v12 = vpop.permute.xlu2 %1258 }
 0x228   : > { %1264 = vst.msk [vmem:[#allocation3 + $0xc] sm:$0xf] %vm1262_vm9, %v1259_v12 }
 0x22f   : > { %v2181_v14 = vld [vmem:[#allocation3 + $0x8] sm:$0xf0]  ;;  %v1885_v30 = vpop.permute.xlu2 %1884 }
 0x230   : > { %v2082_v16 = vor.u32 %v2181_v14, %v2081_v13 }
 0x232   : > { %1836 = vmatmul.bf16.vlgmr.msra.gmra.mxu2 %v2082_v16 }
 0x238   : > { %v1472_v9 = vpop.permute.xlu0 %1471 }
 0x239   : > { %1476 = vst.msk [vmem:[#allocation3 + $0x10] sm:$0xf] %vm1234_vm8, %v1472_v9 }
 0x240   : > { %v1581_v18 = vpop.permute.xlu0 %1580 }
 0x241   : > { %1586 = vst.msk [vmem:[#allocation3 + $0x4] sm:$0xf] %vm1262_vm9, %v1581_v18  ;;  %v1583_v19 = vpop.permute.xlu1 %1582 }
 0x242   : > { %1587 = vst.msk [vmem:[#allocation3 + $0x10] sm:$0xf] %vm1262_vm9, %v1583_v19 }
 0x248   : > { %v2180_v20 = vld [vmem:[#allocation3 + $0x4] sm:$0xf]  ;;  %v1887_v43 = vpop.permute.xlu0 %1886 }
 0x249   : > { %v2083_v21 = vld [vmem:[#allocation3 + $0xc] sm:$0xf0] }
 0x24a   : > { %v2086_v22 = vor.u32 %v2180_v20, %v2083_v21 }
 0x24c   : > { %1850 = vmatmul.bf16.vlgmr.msra.gmra.mxu3 %v2086_v22 }
 0x25f   : > { %v1865_v25 = vpop.f32.mrf.mxu1 }
 0x267   : > { %v1867_v36 = vpop.f32.mrf.mxu1 }
 0x2b5   : > { %v1837_v23 = vpop.f32.mrf.mxu2 }
 0x2bd   : > { %v1839_v33 = vpop.f32.mrf.mxu2 }
 0x2cf   : > { %v1851_v26 = vpop.f32.mrf.mxu3 }
 0x2d0   : > { %v1852_v27 = vadd.f32 %v1851_v26, %v1837_v23 }
 0x2d2   : > { %v1866_v11 = vadd.f32 %v1865_v25, %v1852_v27 }
 0x2d4   : > { %v1874_v29 = vmul.f32 %v2253_v28, %v1866_v11 }
 0x2d6   : > { %v1880_v32 = vadd.f32 %v2254_v31, %v1874_v29 }
 0x2d7   : > { %v1853_v34 = vpop.f32.mrf.mxu3 }
 0x2d8   : > { %v1890_v35 = vadd.f32 %v1885_v30, %v1880_v32  ;;  %v1854_v48 = vadd.f32 %v1853_v34, %v1839_v33 }
 0x2da   : > { %v1892_v37 = vmax.f32 %v1890_v35, 0.0  ;;  %v1868_v38 = vadd.f32 %v1867_v36, %v1854_v48 }
 0x2dc   : > { %v1894_v39 = vpack.c.bf16 %v1892_v37, %v1892_v37  ;;  %v1875_v41 = vmul.f32 %v2253_v28, %v1868_v38 }
 0x2de   : > { %v1881_v50 = vadd.f32 %v2254_v31, %v1875_v41  ;;  %1896 = vst.msk [vmem:[%s271_s19] sm:$0xf] %vm1035_vm7, %v1894_v39 }
 0x2e0   : > { %v1891_v44 = vadd.f32 %v1887_v43, %v1881_v50 }
 0x2e2   : > { %v1893_v45 = vmax.f32 %v1891_v44, 0.0 }
 0x2e4   : > { %v1895_v24 = vpack.c.bf16 %v1893_v45, %v1893_v45 }
 0x2e6   : > { %1897 = vst.msk [vmem:[%s271_s19 + $0x4] sm:$0xf] %vm1035_vm7, %v1895_v24 }
 0x2e7   : > { %2282 = shalt.err (!%p2279_p3)
}
 0x2e8   : > { %s2327_s9 = smov 4  }
 0x2e9   : > { %2203 = dma.vmem_to_hbm [thread:$0]  (%p2406_p5), %s1912_s23, 128, %s1914_s18, %s1899_s28, %s2322_s21, %s2322_s21, %s2327_s9  }
 0x2ea PF: > { %p2209_p4 = scmp.ge.s32.totalorder %s2317_s27, 2  ;;  %s1928_s19 = sand.u32 1, %s2305_s24  }
 0x2eb   : > { %s1929_s16 = scalar_lea.sflag [#allocation6], %s1928_s19 }
 0x2ec   : > { %p2206_p7 = pnand %p2209_p4, %p2410_p6 }
 0x2ee   : > { %p2207_p8 = pneg %p2206_p7 }
 0x2f0   : > { %2300 = dma.done.wait (%p2207_p8), %s1929_s16, 128  }
 0x2f1   : > { %2302 = vsyncadd (%p2207_p8), %s1929_s16, 4294967168  ;;  %p17_p9 = scmp.ge.s32.totalorder %s2393_s30, 4   ;;  %s2905_s24 = smov %s2309_s25 }
 0x2f2   : > { %s2906_s25 = smov %s2313_s26  ;;  %s2907_s26 = smov %s2404_s10 }
 0x2f3   : > { %s2908_s27 = smov %s2393_s30  ;;  %19 = sbr.rel (!%p17_p9) target bundleno = 3 (0x3), region = 145 }
 0x2f8   :  { %1935 = vsyncpa [#allocation6], 1 }
 0x2f9   :  { %1937 = vsyncpa [#allocation6 + $0x1], 1 }

</bundles_post_ra>
